<compile_context>
chip_gen: v7x
topology: tpu7x:2x2x1
jax: 0.10.0
libtpu: 0.0.40
codegen_flags: <defaults>
</compile_context>

<pallas_src>
import math
import jax
import jax.numpy as jnp
from jax.experimental import pallas as pl
from jax.experimental.pallas import tpu as pltpu

LN_EPS = 1e-3  # ImgChLayerNorm eps


# ----------------------------- Pallas kernel --------------------------------
def _make_fused_kernel(h1, w1, cout0, cout1, k, pad_top, pad_left):
    """Two-stage ConvEncoder body, one grid step per batch element.

    Ref order: (patches0, w0, g0, b0, w1, g1, b1, out, act_scratch, lhs_scratch)
      patches0 : [h1*w1, kk*cin0]  f32   im2col of the (unshifted) obs
      w0       : [kk*cin0, cout0]  bf16  stage-0 weight (real width)
      g0/b0    : [1, cout0]        f32   stage-0 LayerNorm affine
      w1       : [kk*cout0, COUTP] bf16  stage-1 weight, K fully dense,
                                         output channels zero-padded to 128
      g1/b1    : [1, COUTP]        f32   stage-1 LN affine, zero-padded
      out      : [h1*w1, COUTP]    f32   stride-1 grid (wrapper subsamples)
      act      : VMEM [h1+k-1, w1+k-1, cout0] f32 zero-bordered activation
      lhs      : VMEM [h1*w1, kk*cout0]       f32 K-stacked stage-1 LHS
    """
    m1 = h1 * w1

    def _ln_silu(x, real_c, g, b):
        # Sum-form LayerNorm over the TRUE channel count; zero-padded lanes
        # (stage 1 only) contribute exactly nothing to the statistics.
        inv_c = 1.0 / float(real_c)
        mean = jnp.sum(x, axis=-1, keepdims=True) * inv_c
        var = jnp.sum(x * x, axis=-1, keepdims=True) * inv_c - mean * mean
        var = jnp.maximum(var, 0.0)
        y = (x - mean) * jax.lax.rsqrt(var + LN_EPS)
        y = y * g + b                    # padded lanes: gamma=beta=0 -> y=0
        return y * jax.nn.sigmoid(y)     # SiLU; silu(0)=0 keeps pads zero

    def kernel(p_ref, w0_ref, g0_ref, b0_ref, w1_ref, g1_ref, b1_ref,
               out_ref, act_ref, lhs_ref):
        # ---------------- stage 0: conv == one MXU matmul --------------------
        # Fold `obs - 0.5` into the load: the im2col patches were spatially
        # padded with 0.5, so SAME-pad positions become exactly 0 (matching
        # torch, which zero-pads *after* the subtraction).
        p = (p_ref[...] - 0.5).astype(jnp.bfloat16)
        x0 = jnp.dot(p, w0_ref[...], preferred_element_type=jnp.float32)
        h0 = _ln_silu(x0, cout0, g0_ref[...], b0_ref[...])       # [m1, cout0]

        # -------- scatter stage-0 activation into padded spatial scratch -----
        act_ref[...] = jnp.zeros(act_ref.shape, act_ref.dtype)
        act_ref[pl.ds(pad_top, h1), pl.ds(pad_left, w1), :] = (
            h0.reshape(h1, w1, cout0))

        # -------- in-kernel im2col: contiguous offset slices, K-stacked ------
        # Tap (kh,kw) of the stride-1 grid is just a shifted window of the
        # zero-bordered scratch; each [m1, cout0] slab lands at lane offset
        # t*cout0 of the staging scratch, making the contraction fully dense.
        for kh in range(k):
            for kw in range(k):
                t = kh * k + kw
                slab = act_ref[pl.ds(kh, h1), pl.ds(kw, w1), :]   # [h1,w1,c]
                lhs_ref[:, pl.ds(t * cout0, cout0)] = slab.reshape(m1, cout0)

        # ---------------- stage 1: one dense K = kk*cout0 matmul -------------
        x1 = jnp.dot(lhs_ref[...].astype(jnp.bfloat16), w1_ref[...],
                     preferred_element_type=jnp.float32)          # [m1, COUTP]
        out_ref[...] = _ln_silu(x1, cout1, g1_ref[...], b1_ref[...])

    return kernel


def fused_conv_encoder_call(patches0, w0, g0, b0, w1m, g1, b1, *,
                            n, h1, w1, cin0, cout0, cout1, coutp, k,
                            pad_top, pad_left):
    m0 = h1 * w1
    k0 = k * k * cin0
    m1 = h1 * w1
    hp = h1 + k - 1
    wp = w1 + k - 1
    kernel = _make_fused_kernel(h1, w1, cout0, cout1, k, pad_top, pad_left)
    return pl.pallas_call(
        kernel,
        out_shape=jax.ShapeDtypeStruct((n * m1, coutp), jnp.float32),
        grid=(n,),                                   # one step per observation
        in_specs=[
            pl.BlockSpec((m0, k0), lambda i: (i, 0)),          # per-batch patches
            pl.BlockSpec(w0.shape, lambda i: (0, 0)),          # weights stay
            pl.BlockSpec(g0.shape, lambda i: (0, 0)),          # resident across
            pl.BlockSpec(b0.shape, lambda i: (0, 0)),          # all grid steps
            pl.BlockSpec(w1m.shape, lambda i: (0, 0)),
            pl.BlockSpec(g1.shape, lambda i: (0, 0)),
            pl.BlockSpec(b1.shape, lambda i: (0, 0)),
        ],
        out_specs=pl.BlockSpec((m1, coutp), lambda i: (i, 0)),  # lane-dense store
        scratch_shapes=[
            pltpu.VMEM((hp, wp, cout0), jnp.float32),     # zero-bordered act
            pltpu.VMEM((m1, k * k * cout0), jnp.float32), # K-stacked conv1 LHS
        ],
        compiler_params=pltpu.CompilerParams(
            dimension_semantics=("parallel",)),           # v7x: split batch
    )(patches0, w0, g0, b0, w1m, g1, b1)


# ------------------------------- JAX glue ------------------------------------
def _same_pad(i, k, s, d=1):
    return max((math.ceil(i / s) - 1) * s + (k - 1) * d + 1 - i, 0)


def im2col_nhwc(x, k, s, pad_value=0.0):
    """x: [N,H,W,C] -> patches [N*Ho*Wo, k*k*C] with cols ordered (kh, kw, c)."""
    N, H, W, C = x.shape
    ph, pw = _same_pad(H, k, s), _same_pad(W, k, s)
    x = jnp.pad(x, ((0, 0), (ph // 2, ph - ph // 2), (pw // 2, pw - pw // 2), (0, 0)),
                constant_values=pad_value)
    Ho = (H + ph - k) // s + 1
    Wo = (W + pw - k) // s + 1
    cols = []
    for kh in range(k):
        for kw in range(k):
            cols.append(x[:, kh:kh + (Ho - 1) * s + 1:s, kw:kw + (Wo - 1) * s + 1:s, :])
    patches = jnp.concatenate(cols, axis=-1)  # [N, Ho, Wo, k*k*C]
    return patches.reshape(N * Ho * Wo, k * k * C), Ho, Wo


def init_conv_encoder_params(key, input_ch, depth, stages, kernel_size=4):
    """Deterministic synthetic init; shapes match the PyTorch module
    (conv weight [Cout,Cin,Kh,Kw], bias=False, channel LayerNorm affine)."""
    params = []
    in_dim, out_dim = input_ch, depth
    for _ in range(stages):
        key, sub = jax.random.split(key)
        fan_in = kernel_size * kernel_size * in_dim
        w = jax.random.normal(sub, (out_dim, in_dim, kernel_size, kernel_size),
                              jnp.float32) / jnp.sqrt(float(fan_in))
        params.append({
            "w": w,
            "gamma": jnp.ones((out_dim,), jnp.float32),
            "beta": jnp.zeros((out_dim,), jnp.float32),
            "cin": in_dim,
            "cout": out_dim,
        })
        in_dim, out_dim = out_dim, out_dim * 2
    return params


def conv_encoder_forward(obs, params, *, kernel_size=4, stride=2):
    """obs: [..., H, W, C] channel-last, matching the PyTorch forward."""
    h, w, c = obs.shape[-3:]
    lead = obs.shape[:-3]
    x = obs.reshape((-1, h, w, c)).astype(jnp.float32)
    n = x.shape[0]
    kk = kernel_size * kernel_size

    # TODO(synk): the fused kernel is specialised to the 2-stage stack this
    # module builds for (16,16,*)/minres=4; deeper stacks would repeat the
    # scratch/gather/matmul block once per extra stage.
    assert len(params) == 2, "fused kernel implements the 2-stage encoder"
    p0, p1 = params
    cin0, cout0 = p0["cin"], p0["cout"]
    cin1, cout1 = p1["cin"], p1["cout"]
    assert cin1 == cout0

    # Stage-0 im2col on the *unshifted* obs, spatially padded with 0.5: the
    # in-kernel (patch - 0.5) then reproduces torch's zero padding of obs-0.5.
    patches0, h1, w1 = im2col_nhwc(x, kernel_size, stride, pad_value=0.5)

    # Stage-0 weight -> [kk*cin0, cout0] bf16 (real channel width, no padding).
    w0 = jnp.transpose(p0["w"], (2, 3, 1, 0)).reshape(kk * cin0, cout0)
    w0 = w0.astype(jnp.bfloat16)
    g0 = p0["gamma"].reshape(1, cout0).astype(jnp.float32)
    b0 = p0["beta"].reshape(1, cout0).astype(jnp.float32)

    # Stage-1 weight -> [kk*cin1, coutp]: contraction is fully dense (no cin
    # padding); only the *output* channels pad to 128 for a lane-dense store.
    coutp = max(128, ((cout1 + 127) // 128) * 128)
    w1m = jnp.transpose(p1["w"], (2, 3, 1, 0)).reshape(kk * cin1, cout1)
    w1m = jnp.pad(w1m, ((0, 0), (0, coutp - cout1))).astype(jnp.bfloat16)
    g1 = jnp.pad(p1["gamma"], (0, coutp - cout1)).reshape(1, coutp).astype(jnp.float32)
    b1 = jnp.pad(p1["beta"], (0, coutp - cout1)).reshape(1, coutp).astype(jnp.float32)

    # Stage-1 SAME-padding geometry.
    ph = _same_pad(h1, kernel_size, stride)
    pw = _same_pad(w1, kernel_size, stride)
    pad_top, pad_left = ph // 2, pw // 2
    h2 = (h1 + ph - kernel_size) // stride + 1
    w2 = (w1 + pw - kernel_size) // stride + 1

    out = fused_conv_encoder_call(
        patches0, w0, g0, b0, w1m, g1, b1,
        n=n, h1=h1, w1=w1, cin0=cin0, cout0=cout0, cout1=cout1, coutp=coutp,
        k=kernel_size, pad_top=pad_top, pad_left=pad_left)

    # The kernel evaluates the second conv on the full stride-1 grid; keep the
    # stride-2 rows/cols and the real channels, then flatten in NCHW order.
    out = out.reshape(n, h1, w1, coutp)[:, ::stride, ::stride, :cout1]
    out = out[:, :h2, :w2, :]
    out = jnp.transpose(out, (0, 3, 1, 2)).reshape(n, -1)
    return out.reshape(tuple(lead) + (out.shape[-1],))


def reference_forward(obs, params, *, kernel_size=4, stride=2):
    """Pure-JAX f32 reference mirroring the PyTorch module exactly."""
    h, w, c = obs.shape[-3:]
    lead = obs.shape[:-3]
    x = obs.reshape((-1, h, w, c)).astype(jnp.float32) - 0.5
    x = jnp.transpose(x, (0, 3, 1, 2))  # NCHW
    for p in params:
        ih, iw = x.shape[-2:]
        ph = _same_pad(ih, kernel_size, stride)
        pw = _same_pad(iw, kernel_size, stride)
        x = jnp.pad(x, ((0, 0), (0, 0),
                        (ph // 2, ph - ph // 2), (pw // 2, pw - pw // 2)))
        x = jax.lax.conv_general_dilated(
            x, p["w"], (stride, stride), "VALID",
            dimension_numbers=("NCHW", "OIHW", "NCHW"))
        mean = jnp.mean(x, axis=1, keepdims=True)
        var = jnp.mean((x - mean) ** 2, axis=1, keepdims=True)
        y = (x - mean) * jax.lax.rsqrt(var + LN_EPS)
        y = y * p["gamma"][None, :, None, None] + p["beta"][None, :, None, None]
        x = y * jax.nn.sigmoid(y)
    n = x.shape[0]
    x = x.reshape(n, -1)
    return x.reshape(tuple(lead) + (x.shape[-1],))


# --------------------------------- main --------------------------------------
if __name__ == "__main__":
    # input_shape = (h, w, c) = (16, 16, 4); depth=8; minres=4 -> stages = 2
    h, w, c = 16, 16, 4
    depth, minres, ksize = 8, 4, 4
    stages = int(math.log2(w) - math.log2(minres))            # 2
    out_dim_final = depth * (2 ** (stages - 1))                # 16
    expected_outdim = out_dim_final * (h // (2 ** stages)) * (w // (2 ** stages))  # 256

    key = jax.random.PRNGKey(0)
    k_obs, k_par = jax.random.split(key)
    obs = jax.random.uniform(k_obs, (2, h, w, c), jnp.float32)  # batch=2, [B,H,W,C]
    params = init_conv_encoder_params(k_par, c, depth, stages, kernel_size=ksize)

    out = conv_encoder_forward(obs, params, kernel_size=ksize, stride=2)
    out = jax.block_until_ready(out)

    ref = reference_forward(obs, params, kernel_size=ksize, stride=2)
    ref = jax.block_until_ready(ref)

    assert out.shape == (2, expected_outdim), out.shape
    assert out.dtype == jnp.float32
    assert bool(jnp.all(jnp.isfinite(out)))
    err = float(jnp.max(jnp.abs(out - ref)))
    assert err < 1e-1, f"max abs err vs f32 reference: {err}"  # bf16 MXU inputs
    print("KERNEL_OK")
</pallas_src>

<mosaic_0001>
module attributes {stable_mosaic.version = 11 : i64} {
  func.func @kernel(%arg0: i32, %arg1: memref<64x64xf32, #tpu.memory_space<vmem>>, %arg2: memref<64x8xbf16, #tpu.memory_space<vmem>>, %arg3: memref<1x8xf32, #tpu.memory_space<vmem>>, %arg4: memref<1x8xf32, #tpu.memory_space<vmem>>, %arg5: memref<128x128xbf16, #tpu.memory_space<vmem>>, %arg6: memref<1x128xf32, #tpu.memory_space<vmem>>, %arg7: memref<1x128xf32, #tpu.memory_space<vmem>>, %arg8: memref<64x128xf32, #tpu.memory_space<vmem>>, %arg9: memref<11x11x8xf32, #tpu.memory_space<vmem>>, %arg10: memref<64x128xf32, #tpu.memory_space<vmem>>) attributes {dimension_semantics = [#tpu.dimension_semantics<parallel>], iteration_bounds = array<i64: 2>, scalar_prefetch = 0 : i64, scratch_operands = 2 : i64, tpu.core_type = #tpu.core_type<tc>, window_params = [{transform_indices = @transform_0, window_bounds = array<i64: 64, 64>}, {pipeline_mode = #tpu.pipeline_mode<synchronous>, transform_indices = @transform_1, window_bounds = array<i64: 64, 8>}, {pipeline_mode = #tpu.pipeline_mode<synchronous>, transform_indices = @transform_2, window_bounds = array<i64: 1, 8>}, {pipeline_mode = #tpu.pipeline_mode<synchronous>, transform_indices = @transform_3, window_bounds = array<i64: 1, 8>}, {pipeline_mode = #tpu.pipeline_mode<synchronous>, transform_indices = @transform_4, window_bounds = array<i64: 128, 128>}, {pipeline_mode = #tpu.pipeline_mode<synchronous>, transform_indices = @transform_5, window_bounds = array<i64: 1, 128>}, {pipeline_mode = #tpu.pipeline_mode<synchronous>, transform_indices = @transform_6, window_bounds = array<i64: 1, 128>}, {transform_indices = @transform_7, window_bounds = array<i64: 64, 128>}]} {
    %c0 = arith.constant 0 : index
    %c0_0 = arith.constant 0 : index
    %0 = vector.load %arg1[%c0, %c0_0] : memref<64x64xf32, #tpu.memory_space<vmem>>, vector<64x64xf32>
    %cst = arith.constant 5.000000e-01 : f32
    %1 = vector.broadcast %cst : f32 to vector<64x64xf32>
    %2 = arith.subf %0, %1 : vector<64x64xf32>
    %3 = arith.truncf %2 : vector<64x64xf32> to vector<64x64xbf16>
    %c0_1 = arith.constant 0 : index
    %c0_2 = arith.constant 0 : index
    %4 = vector.load %arg2[%c0_1, %c0_2] : memref<64x8xbf16, #tpu.memory_space<vmem>>, vector<64x8xbf16>
    %cst_3 = arith.constant dense<0.000000e+00> : vector<64x8xf32>
    %5 = tpu.matmul %3, %4, %cst_3 {dimension_numbers = #tpu.dot_dimension_numbers<[1], [0], [0], [1], [0, 0, 1, 1], [], []>} : vector<64x64xbf16>, vector<64x8xbf16>, vector<64x8xf32> -> vector<64x8xf32>
    %c0_4 = arith.constant 0 : index
    %c0_5 = arith.constant 0 : index
    %6 = vector.load %arg3[%c0_4, %c0_5] : memref<1x8xf32, #tpu.memory_space<vmem>>, vector<1x8xf32>
    %c0_6 = arith.constant 0 : index
    %c0_7 = arith.constant 0 : index
    %7 = vector.load %arg4[%c0_6, %c0_7] : memref<1x8xf32, #tpu.memory_space<vmem>>, vector<1x8xf32>
    %cst_8 = arith.constant dense<0.000000e+00> : vector<64xf32>
    %8 = vector.multi_reduction <add>, %5, %cst_8 [1] : vector<64x8xf32> to vector<64xf32>
    %9 = vector.shape_cast %8 : vector<64xf32> to vector<64x1xf32>
    %cst_9 = arith.constant 1.250000e-01 : f32
    %10 = vector.broadcast %cst_9 : f32 to vector<64x1xf32>
    %11 = arith.mulf %9, %10 : vector<64x1xf32>
    %12 = arith.mulf %5, %5 : vector<64x8xf32>
    %cst_10 = arith.constant dense<0.000000e+00> : vector<64xf32>
    %13 = vector.multi_reduction <add>, %12, %cst_10 [1] : vector<64x8xf32> to vector<64xf32>
    %14 = vector.shape_cast %13 : vector<64xf32> to vector<64x1xf32>
    %cst_11 = arith.constant 1.250000e-01 : f32
    %15 = vector.broadcast %cst_11 : f32 to vector<64x1xf32>
    %16 = arith.mulf %14, %15 : vector<64x1xf32>
    %17 = arith.mulf %11, %11 : vector<64x1xf32>
    %18 = arith.subf %16, %17 : vector<64x1xf32>
    %cst_12 = arith.constant 0.000000e+00 : f32
    %19 = vector.broadcast %cst_12 : f32 to vector<64x1xf32>
    %20 = arith.maximumf %18, %19 : vector<64x1xf32>
    %21 = vector.broadcast %11 : vector<64x1xf32> to vector<64x8xf32>
    %22 = arith.subf %5, %21 : vector<64x8xf32>
    %cst_13 = arith.constant 1.000000e-03 : f32
    %23 = vector.broadcast %cst_13 : f32 to vector<64x1xf32>
    %24 = arith.addf %20, %23 : vector<64x1xf32>
    %25 = math.rsqrt %24 : vector<64x1xf32>
    %26 = vector.broadcast %25 : vector<64x1xf32> to vector<64x8xf32>
    %27 = arith.mulf %22, %26 : vector<64x8xf32>
    %28 = vector.broadcast %6 : vector<1x8xf32> to vector<64x8xf32>
    %29 = arith.mulf %27, %28 : vector<64x8xf32>
    %30 = vector.broadcast %7 : vector<1x8xf32> to vector<64x8xf32>
    %31 = arith.addf %29, %30 : vector<64x8xf32>
    %32 = arith.negf %31 : vector<64x8xf32>
    %33 = math.exp %32 : vector<64x8xf32>
    %cst_14 = arith.constant 1.000000e+00 : f32
    %34 = vector.broadcast %cst_14 : f32 to vector<64x8xf32>
    %35 = arith.addf %34, %33 : vector<64x8xf32>
    %36 = arith.divf %34, %35 : vector<64x8xf32>
    %37 = arith.mulf %31, %36 : vector<64x8xf32>
    %cst_15 = arith.constant 0.000000e+00 : f32
    %38 = vector.broadcast %cst_15 : f32 to vector<11x11x8xf32>
    %c0_16 = arith.constant 0 : index
    %c0_17 = arith.constant 0 : index
    %c0_18 = arith.constant 0 : index
    %39 = vector.load %arg9[%c0_16, %c0_17, %c0_18] : memref<11x11x8xf32, #tpu.memory_space<vmem>>, vector<11x11x8xf32>
    tpu.vector_store %arg9[%c0_16, %c0_17, %c0_18], %38 {strides = array<i32>} : memref<11x11x8xf32, #tpu.memory_space<vmem>>, vector<11x11x8xf32>,
    %40 = vector.shape_cast %37 : vector<64x8xf32> to vector<8x8x8xf32>
    %c1 = arith.constant 1 : index
    %c1_19 = arith.constant 1 : index
    %c0_20 = arith.constant 0 : index
    %41 = vector.load %arg9[%c1, %c1_19, %c0_20] : memref<11x11x8xf32, #tpu.memory_space<vmem>>, vector<8x8x8xf32>
    tpu.vector_store %arg9[%c1, %c1_19, %c0_20], %40 {strides = array<i32>} : memref<11x11x8xf32, #tpu.memory_space<vmem>>, vector<8x8x8xf32>,
    %c0_21 = arith.constant 0 : index
    %c0_22 = arith.constant 0 : index
    %c0_23 = arith.constant 0 : index
    %42 = vector.load %arg9[%c0_21, %c0_22, %c0_23] : memref<11x11x8xf32, #tpu.memory_space<vmem>>, vector<8x8x8xf32>
    %43 = vector.shape_cast %42 : vector<8x8x8xf32> to vector<64x8xf32>
    %c0_24 = arith.constant 0 : index
    %c0_25 = arith.constant 0 : index
    %44 = vector.load %arg10[%c0_24, %c0_25] : memref<64x128xf32, #tpu.memory_space<vmem>>, vector<64x8xf32>
    tpu.vector_store %arg10[%c0_24, %c0_25], %43 {strides = array<i32>} : memref<64x128xf32, #tpu.memory_space<vmem>>, vector<64x8xf32>,
    %c0_26 = arith.constant 0 : index
    %c1_27 = arith.constant 1 : index
    %c0_28 = arith.constant 0 : index
    %45 = vector.load %arg9[%c0_26, %c1_27, %c0_28] : memref<11x11x8xf32, #tpu.memory_space<vmem>>, vector<8x8x8xf32>
    %46 = vector.shape_cast %45 : vector<8x8x8xf32> to vector<64x8xf32>
    %c0_29 = arith.constant 0 : index
    %c8 = arith.constant 8 : index
    %47 = vector.load %arg10[%c0_29, %c8] : memref<64x128xf32, #tpu.memory_space<vmem>>, vector<64x8xf32>
    tpu.vector_store %arg10[%c0_29, %c8], %46 {strides = array<i32>} : memref<64x128xf32, #tpu.memory_space<vmem>>, vector<64x8xf32>,
    %c0_30 = arith.constant 0 : index
    %c2 = arith.constant 2 : index
    %c0_31 = arith.constant 0 : index
    %48 = vector.load %arg9[%c0_30, %c2, %c0_31] : memref<11x11x8xf32, #tpu.memory_space<vmem>>, vector<8x8x8xf32>
    %49 = vector.shape_cast %48 : vector<8x8x8xf32> to vector<64x8xf32>
    %c0_32 = arith.constant 0 : index
    %c16 = arith.constant 16 : index
    %50 = vector.load %arg10[%c0_32, %c16] : memref<64x128xf32, #tpu.memory_space<vmem>>, vector<64x8xf32>
    tpu.vector_store %arg10[%c0_32, %c16], %49 {strides = array<i32>} : memref<64x128xf32, #tpu.memory_space<vmem>>, vector<64x8xf32>,
    %c0_33 = arith.constant 0 : index
    %c3 = arith.constant 3 : index
    %c0_34 = arith.constant 0 : index
    %51 = vector.load %arg9[%c0_33, %c3, %c0_34] : memref<11x11x8xf32, #tpu.memory_space<vmem>>, vector<8x8x8xf32>
    %52 = vector.shape_cast %51 : vector<8x8x8xf32> to vector<64x8xf32>
    %c0_35 = arith.constant 0 : index
    %c24 = arith.constant 24 : index
    %53 = vector.load %arg10[%c0_35, %c24] : memref<64x128xf32, #tpu.memory_space<vmem>>, vector<64x8xf32>
    tpu.vector_store %arg10[%c0_35, %c24], %52 {strides = array<i32>} : memref<64x128xf32, #tpu.memory_space<vmem>>, vector<64x8xf32>,
    %c1_36 = arith.constant 1 : index
    %c0_37 = arith.constant 0 : index
    %c0_38 = arith.constant 0 : index
    %54 = vector.load %arg9[%c1_36, %c0_37, %c0_38] : memref<11x11x8xf32, #tpu.memory_space<vmem>>, vector<8x8x8xf32>
    %55 = vector.shape_cast %54 : vector<8x8x8xf32> to vector<64x8xf32>
    %c0_39 = arith.constant 0 : index
    %c32 = arith.constant 32 : index
    %56 = vector.load %arg10[%c0_39, %c32] : memref<64x128xf32, #tpu.memory_space<vmem>>, vector<64x8xf32>
    tpu.vector_store %arg10[%c0_39, %c32], %55 {strides = array<i32>} : memref<64x128xf32, #tpu.memory_space<vmem>>, vector<64x8xf32>,
    %c1_40 = arith.constant 1 : index
    %c1_41 = arith.constant 1 : index
    %c0_42 = arith.constant 0 : index
    %57 = vector.load %arg9[%c1_40, %c1_41, %c0_42] : memref<11x11x8xf32, #tpu.memory_space<vmem>>, vector<8x8x8xf32>
    %58 = vector.shape_cast %57 : vector<8x8x8xf32> to vector<64x8xf32>
    %c0_43 = arith.constant 0 : index
    %c40 = arith.constant 40 : index
    %59 = vector.load %arg10[%c0_43, %c40] : memref<64x128xf32, #tpu.memory_space<vmem>>, vector<64x8xf32>
    tpu.vector_store %arg10[%c0_43, %c40], %58 {strides = array<i32>} : memref<64x128xf32, #tpu.memory_space<vmem>>, vector<64x8xf32>,
    %c1_44 = arith.constant 1 : index
    %c2_45 = arith.constant 2 : index
    %c0_46 = arith.constant 0 : index
    %60 = vector.load %arg9[%c1_44, %c2_45, %c0_46] : memref<11x11x8xf32, #tpu.memory_space<vmem>>, vector<8x8x8xf32>
    %61 = vector.shape_cast %60 : vector<8x8x8xf32> to vector<64x8xf32>
    %c0_47 = arith.constant 0 : index
    %c48 = arith.constant 48 : index
    %62 = vector.load %arg10[%c0_47, %c48] : memref<64x128xf32, #tpu.memory_space<vmem>>, vector<64x8xf32>
    tpu.vector_store %arg10[%c0_47, %c48], %61 {strides = array<i32>} : memref<64x128xf32, #tpu.memory_space<vmem>>, vector<64x8xf32>,
    %c1_48 = arith.constant 1 : index
    %c3_49 = arith.constant 3 : index
    %c0_50 = arith.constant 0 : index
    %63 = vector.load %arg9[%c1_48, %c3_49, %c0_50] : memref<11x11x8xf32, #tpu.memory_space<vmem>>, vector<8x8x8xf32>
    %64 = vector.shape_cast %63 : vector<8x8x8xf32> to vector<64x8xf32>
    %c0_51 = arith.constant 0 : index
    %c56 = arith.constant 56 : index
    %65 = vector.load %arg10[%c0_51, %c56] : memref<64x128xf32, #tpu.memory_space<vmem>>, vector<64x8xf32>
    tpu.vector_store %arg10[%c0_51, %c56], %64 {strides = array<i32>} : memref<64x128xf32, #tpu.memory_space<vmem>>, vector<64x8xf32>,
    %c2_52 = arith.constant 2 : index
    %c0_53 = arith.constant 0 : index
    %c0_54 = arith.constant 0 : index
    %66 = vector.load %arg9[%c2_52, %c0_53, %c0_54] : memref<11x11x8xf32, #tpu.memory_space<vmem>>, vector<8x8x8xf32>
    %67 = vector.shape_cast %66 : vector<8x8x8xf32> to vector<64x8xf32>
    %c0_55 = arith.constant 0 : index
    %c64 = arith.constant 64 : index
    %68 = vector.load %arg10[%c0_55, %c64] : memref<64x128xf32, #tpu.memory_space<vmem>>, vector<64x8xf32>
    tpu.vector_store %arg10[%c0_55, %c64], %67 {strides = array<i32>} : memref<64x128xf32, #tpu.memory_space<vmem>>, vector<64x8xf32>,
    %c2_56 = arith.constant 2 : index
    %c1_57 = arith.constant 1 : index
    %c0_58 = arith.constant 0 : index
    %69 = vector.load %arg9[%c2_56, %c1_57, %c0_58] : memref<11x11x8xf32, #tpu.memory_space<vmem>>, vector<8x8x8xf32>
    %70 = vector.shape_cast %69 : vector<8x8x8xf32> to vector<64x8xf32>
    %c0_59 = arith.constant 0 : index
    %c72 = arith.constant 72 : index
    %71 = vector.load %arg10[%c0_59, %c72] : memref<64x128xf32, #tpu.memory_space<vmem>>, vector<64x8xf32>
    tpu.vector_store %arg10[%c0_59, %c72], %70 {strides = array<i32>} : memref<64x128xf32, #tpu.memory_space<vmem>>, vector<64x8xf32>,
    %c2_60 = arith.constant 2 : index
    %c2_61 = arith.constant 2 : index
    %c0_62 = arith.constant 0 : index
    %72 = vector.load %arg9[%c2_60, %c2_61, %c0_62] : memref<11x11x8xf32, #tpu.memory_space<vmem>>, vector<8x8x8xf32>
    %73 = vector.shape_cast %72 : vector<8x8x8xf32> to vector<64x8xf32>
    %c0_63 = arith.constant 0 : index
    %c80 = arith.constant 80 : index
    %74 = vector.load %arg10[%c0_63, %c80] : memref<64x128xf32, #tpu.memory_space<vmem>>, vector<64x8xf32>
    tpu.vector_store %arg10[%c0_63, %c80], %73 {strides = array<i32>} : memref<64x128xf32, #tpu.memory_space<vmem>>, vector<64x8xf32>,
    %c2_64 = arith.constant 2 : index
    %c3_65 = arith.constant 3 : index
    %c0_66 = arith.constant 0 : index
    %75 = vector.load %arg9[%c2_64, %c3_65, %c0_66] : memref<11x11x8xf32, #tpu.memory_space<vmem>>, vector<8x8x8xf32>
    %76 = vector.shape_cast %75 : vector<8x8x8xf32> to vector<64x8xf32>
    %c0_67 = arith.constant 0 : index
    %c88 = arith.constant 88 : index
    %77 = vector.load %arg10[%c0_67, %c88] : memref<64x128xf32, #tpu.memory_space<vmem>>, vector<64x8xf32>
    tpu.vector_store %arg10[%c0_67, %c88], %76 {strides = array<i32>} : memref<64x128xf32, #tpu.memory_space<vmem>>, vector<64x8xf32>,
    %c3_68 = arith.constant 3 : index
    %c0_69 = arith.constant 0 : index
    %c0_70 = arith.constant 0 : index
    %78 = vector.load %arg9[%c3_68, %c0_69, %c0_70] : memref<11x11x8xf32, #tpu.memory_space<vmem>>, vector<8x8x8xf32>
    %79 = vector.shape_cast %78 : vector<8x8x8xf32> to vector<64x8xf32>
    %c0_71 = arith.constant 0 : index
    %c96 = arith.constant 96 : index
    %80 = vector.load %arg10[%c0_71, %c96] : memref<64x128xf32, #tpu.memory_space<vmem>>, vector<64x8xf32>
    tpu.vector_store %arg10[%c0_71, %c96], %79 {strides = array<i32>} : memref<64x128xf32, #tpu.memory_space<vmem>>, vector<64x8xf32>,
    %c3_72 = arith.constant 3 : index
    %c1_73 = arith.constant 1 : index
    %c0_74 = arith.constant 0 : index
    %81 = vector.load %arg9[%c3_72, %c1_73, %c0_74] : memref<11x11x8xf32, #tpu.memory_space<vmem>>, vector<8x8x8xf32>
    %82 = vector.shape_cast %81 : vector<8x8x8xf32> to vector<64x8xf32>
    %c0_75 = arith.constant 0 : index
    %c104 = arith.constant 104 : index
    %83 = vector.load %arg10[%c0_75, %c104] : memref<64x128xf32, #tpu.memory_space<vmem>>, vector<64x8xf32>
    tpu.vector_store %arg10[%c0_75, %c104], %82 {strides = array<i32>} : memref<64x128xf32, #tpu.memory_space<vmem>>, vector<64x8xf32>,
    %c3_76 = arith.constant 3 : index
    %c2_77 = arith.constant 2 : index
    %c0_78 = arith.constant 0 : index
    %84 = vector.load %arg9[%c3_76, %c2_77, %c0_78] : memref<11x11x8xf32, #tpu.memory_space<vmem>>, vector<8x8x8xf32>
    %85 = vector.shape_cast %84 : vector<8x8x8xf32> to vector<64x8xf32>
    %c0_79 = arith.constant 0 : index
    %c112 = arith.constant 112 : index
    %86 = vector.load %arg10[%c0_79, %c112] : memref<64x128xf32, #tpu.memory_space<vmem>>, vector<64x8xf32>
    tpu.vector_store %arg10[%c0_79, %c112], %85 {strides = array<i32>} : memref<64x128xf32, #tpu.memory_space<vmem>>, vector<64x8xf32>,
    %c3_80 = arith.constant 3 : index
    %c3_81 = arith.constant 3 : index
    %c0_82 = arith.constant 0 : index
    %87 = vector.load %arg9[%c3_80, %c3_81, %c0_82] : memref<11x11x8xf32, #tpu.memory_space<vmem>>, vector<8x8x8xf32>
    %88 = vector.shape_cast %87 : vector<8x8x8xf32> to vector<64x8xf32>
    %c0_83 = arith.constant 0 : index
    %c120 = arith.constant 120 : index
    %89 = vector.load %arg10[%c0_83, %c120] : memref<64x128xf32, #tpu.memory_space<vmem>>, vector<64x8xf32>
    tpu.vector_store %arg10[%c0_83, %c120], %88 {strides = array<i32>} : memref<64x128xf32, #tpu.memory_space<vmem>>, vector<64x8xf32>,
    %c0_84 = arith.constant 0 : index
    %c0_85 = arith.constant 0 : index
    %90 = vector.load %arg10[%c0_84, %c0_85] : memref<64x128xf32, #tpu.memory_space<vmem>>, vector<64x128xf32>
    %91 = arith.truncf %90 : vector<64x128xf32> to vector<64x128xbf16>
    %c0_86 = arith.constant 0 : index
    %c0_87 = arith.constant 0 : index
    %92 = vector.load %arg5[%c0_86, %c0_87] : memref<128x128xbf16, #tpu.memory_space<vmem>>, vector<128x128xbf16>
    %cst_88 = arith.constant dense<0.000000e+00> : vector<64x128xf32>
    %93 = tpu.matmul %91, %92, %cst_88 {dimension_numbers = #tpu.dot_dimension_numbers<[1], [0], [0], [1], [0, 0, 1, 1], [], []>} : vector<64x128xbf16>, vector<128x128xbf16>, vector<64x128xf32> -> vector<64x128xf32>
    %c0_89 = arith.constant 0 : index
    %c0_90 = arith.constant 0 : index
    %94 = vector.load %arg6[%c0_89, %c0_90] : memref<1x128xf32, #tpu.memory_space<vmem>>, vector<1x128xf32>
    %c0_91 = arith.constant 0 : index
    %c0_92 = arith.constant 0 : index
    %95 = vector.load %arg7[%c0_91, %c0_92] : memref<1x128xf32, #tpu.memory_space<vmem>>, vector<1x128xf32>
    %cst_93 = arith.constant dense<0.000000e+00> : vector<64xf32>
    %96 = vector.multi_reduction <add>, %93, %cst_93 [1] : vector<64x128xf32> to vector<64xf32>
    %97 = vector.shape_cast %96 : vector<64xf32> to vector<64x1xf32>
    %cst_94 = arith.constant 6.250000e-02 : f32
    %98 = vector.broadcast %cst_94 : f32 to vector<64x1xf32>
    %99 = arith.mulf %97, %98 : vector<64x1xf32>
    %100 = arith.mulf %93, %93 : vector<64x128xf32>
    %cst_95 = arith.constant dense<0.000000e+00> : vector<64xf32>
    %101 = vector.multi_reduction <add>, %100, %cst_95 [1] : vector<64x128xf32> to vector<64xf32>
    %102 = vector.shape_cast %101 : vector<64xf32> to vector<64x1xf32>
    %cst_96 = arith.constant 6.250000e-02 : f32
    %103 = vector.broadcast %cst_96 : f32 to vector<64x1xf32>
    %104 = arith.mulf %102, %103 : vector<64x1xf32>
    %105 = arith.mulf %99, %99 : vector<64x1xf32>
    %106 = arith.subf %104, %105 : vector<64x1xf32>
    %cst_97 = arith.constant 0.000000e+00 : f32
    %107 = vector.broadcast %cst_97 : f32 to vector<64x1xf32>
    %108 = arith.maximumf %106, %107 : vector<64x1xf32>
    %109 = vector.broadcast %99 : vector<64x1xf32> to vector<64x128xf32>
    %110 = arith.subf %93, %109 : vector<64x128xf32>
    %cst_98 = arith.constant 1.000000e-03 : f32
    %111 = vector.broadcast %cst_98 : f32 to vector<64x1xf32>
    %112 = arith.addf %108, %111 : vector<64x1xf32>
    %113 = math.rsqrt %112 : vector<64x1xf32>
    %114 = vector.broadcast %113 : vector<64x1xf32> to vector<64x128xf32>
    %115 = arith.mulf %110, %114 : vector<64x128xf32>
    %116 = vector.broadcast %94 : vector<1x128xf32> to vector<64x128xf32>
    %117 = arith.mulf %115, %116 : vector<64x128xf32>
    %118 = vector.broadcast %95 : vector<1x128xf32> to vector<64x128xf32>
    %119 = arith.addf %117, %118 : vector<64x128xf32>
    %120 = arith.negf %119 : vector<64x128xf32>
    %121 = math.exp %120 : vector<64x128xf32>
    %cst_99 = arith.constant 1.000000e+00 : f32
    %122 = vector.broadcast %cst_99 : f32 to vector<64x128xf32>
    %123 = arith.addf %122, %121 : vector<64x128xf32>
    %124 = arith.divf %122, %123 : vector<64x128xf32>
    %125 = arith.mulf %119, %124 : vector<64x128xf32>
    %c0_100 = arith.constant 0 : index
    %c0_101 = arith.constant 0 : index
    %126 = vector.load %arg8[%c0_100, %c0_101] : memref<64x128xf32, #tpu.memory_space<vmem>>, vector<64x128xf32>
    tpu.vector_store %arg8[%c0_100, %c0_101], %125 {strides = array<i32>} : memref<64x128xf32, #tpu.memory_space<vmem>>, vector<64x128xf32>,
    return
  }
  func.func @transform_0(%arg0: i32) -> (i32, i32) {
    %c0_i32 = arith.constant 0 : i32
    %c0_i32_0 = arith.constant 0 : i32
    return %arg0, %c0_i32 : i32, i32
  }
  func.func @transform_1(%arg0: i32) -> (i32, i32) {
    %c0_i32 = arith.constant 0 : i32
    %c0_i32_0 = arith.constant 0 : i32
    %c0_i32_1 = arith.constant 0 : i32
    return %c0_i32, %c0_i32_0 : i32, i32
  }
  func.func @transform_2(%arg0: i32) -> (i32, i32) {
    %c0_i32 = arith.constant 0 : i32
    %c0_i32_0 = arith.constant 0 : i32
    %c0_i32_1 = arith.constant 0 : i32
    return %c0_i32, %c0_i32_0 : i32, i32
  }
  func.func @transform_3(%arg0: i32) -> (i32, i32) {
    %c0_i32 = arith.constant 0 : i32
    %c0_i32_0 = arith.constant 0 : i32
    %c0_i32_1 = arith.constant 0 : i32
    return %c0_i32, %c0_i32_0 : i32, i32
  }
  func.func @transform_4(%arg0: i32) -> (i32, i32) {
    %c0_i32 = arith.constant 0 : i32
    %c0_i32_0 = arith.constant 0 : i32
    %c0_i32_1 = arith.constant 0 : i32
    return %c0_i32, %c0_i32_0 : i32, i32
  }
  func.func @transform_5(%arg0: i32) -> (i32, i32) {
    %c0_i32 = arith.constant 0 : i32
    %c0_i32_0 = arith.constant 0 : i32
    %c0_i32_1 = arith.constant 0 : i32
    return %c0_i32, %c0_i32_0 : i32, i32
  }
  func.func @transform_6(%arg0: i32) -> (i32, i32) {
    %c0_i32 = arith.constant 0 : i32
    %c0_i32_0 = arith.constant 0 : i32
    %c0_i32_1 = arith.constant 0 : i32
    return %c0_i32, %c0_i32_0 : i32, i32
  }
  func.func @transform_7(%arg0: i32) -> (i32, i32) {
    %c0_i32 = arith.constant 0 : i32
    %c0_i32_0 = arith.constant 0 : i32
    return %arg0, %c0_i32 : i32, i32
  }
}

</mosaic_0001>

<bundles_post_ra>
// kernel: tpu_custom_call.1
= control target key start
LH: loop header
LB: loop body
LE: loop exit
PB: predicated region body
PF: predicated region fallthrough
CT: control target
= control target key end

     0   :  { %12 = vsyncpa [#allocation5], 0  ;;  %s3091_s0 = inlined_call_operand.vmem [shape: f32[128,64], index: 0, kind: input, shape index: {}]   ;;  %s3092_s1 = inlined_call_operand.vmem [shape: bf16[64,8], index: 1, kind: input, shape index: {}]   ;;  %s3093_s2 = inlined_call_operand.vmem [shape: f32[1,8], index: 2, kind: input, shape index: {}]   ;;  %s3094_s3 = inlined_call_operand.vmem [shape: f32[1,8], index: 3, kind: input, shape index: {}]   ;;  %s3095_s4 = inlined_call_operand.vmem [shape: bf16[128,128], index: 4, kind: input, shape index: {}]   ;;  %s3096_s5 = inlined_call_operand.vmem [shape: f32[1,128], index: 5, kind: input, shape index: {}]   ;;  %s3097_s6 = inlined_call_operand.vmem [shape: f32[1,128], index: 6, kind: input, shape index: {}]   ;;  %s3098_s7 = inlined_call_operand.hbm [shape: f32[128,128], index: 7, kind: output, shape index: {}]  }
   0x1   :  { %14 = vsyncpa [#allocation5 + $0x1], 0  ;;  %s2237_s24 = smov 0   ;;  %s2239_s25 = smov 0  }
   0x2   :  { %s2241_s26 = smov 0   ;;  %s2243_s27 = smov 0  }
   0x3 LB: > { %s2258_s28 = sadd.s32 4294967295, %s2177_s27   ;;  %s1834_s29 = sadd.s32 4294967294, %s2177_s27   ;;  %s2177_s27 = sphi %s2243_s27, %s3128_s27   ;;  %s2173_s26 = sphi %s2241_s26, %s3127_s26   ;;  %s2169_s25 = sphi %s2239_s25, %s3126_s25   ;;  %s2165_s24 = sphi %s2237_s24, %s3125_s24  }
   0x4   : > { %s2262_s30 = sadd.s32 1, %s2177_s27   ;;  %s179_s8 = sadd.s32 1, %s2173_s26 }
   0x5   : > { %s176_s9 = ssub.s32 %s2177_s27, %s2262_s30  ;;  %p189_p0 = scmp.ne.s32.totalorder %s2173_s26, %s2169_s25 }
   0x6   : > { %p177_p1 = scmp.eq.s32.totalorder %s176_s9, 0  ;;  %p190_p2 = scmp.eq.s32.totalorder %s2258_s28, 1 }
   0x7   : > { %p195_p3 = scmp.ne.s32.totalorder %s2169_s25, %s2165_s24  ;;  %p196_p4 = scmp.eq.s32.totalorder %s1834_s29, 1 }
   0x8   : > { %s2273_s10 = scalar_select %p177_p1, %s2173_s26, %s179_s8  }
   0x9   : > { %p2275_p5 = por %p190_p2, %p189_p0  ;;  %p2279_p6 = por %p196_p4, %p195_p3 }
   0xa   : > { %p1837_p7 = scmp.ge.s32.totalorder %s2177_s27, 1  ;;  %p241_p8 = scmp.lt.s32.totalorder %s2177_s27, 3 }
   0xc   : > { %p242_p9 = pnand %p1837_p7, %p241_p8 }
   0xd   : > { %v2007_v0 = vld [vmem:[%s3092_s1] sm:$0xff] (!%p242_p9)   ;;  %s1839_s15 = sshll.u32 (!%p242_p9), %s2258_s28, 3  ;;  %v2008_v1 = vld [vmem:[%s3092_s1 + $0x8] sm:$0xff] (!%p242_p9)   ;;  %v2009_v2 = vld [vmem:[%s3092_s1 + $0x10] sm:$0xff] (!%p242_p9)   ;;  %vm413_vm0 = vcmask (!%p242_p9), 64512   ;;  %vm627_vm1 = vcmask (!%p242_p9), 59392  }
   0xe   : > { %245 = sbr.rel (%p242_p9) target bundleno = 1239 (0x4d7), region = 48  ;;  %p274_p10 = scmp.lt.s32.totalorder (!%p242_p9), %s1839_s15, 15  ;;  %1911 = vmatprep.subr.bf16.mxu0 (!%p242_p9), %v2007_v0  ;;  %v2179_v3 = vmov (!%p242_p9), 0.0   ;;  %v2010_v4 = vld [vmem:[%s3092_s1 + $0x18] sm:$0xff] (!%p242_p9)   ;;  %vm333_vm2 = vcmask (!%p242_p9), 523264   ;;  %vm714_vm3 = vcmask (!%p242_p9), 130112  }
   0xf   : > { %1912 = vmatpush3.bf16.msra.mxu0 (!%p242_p9), %v2007_v0  ;;  %645 = vst.msk [vmem:[#allocation2 + $0x90] sm:$0xff] (!%p242_p9), %vm413_vm0, %v2179_v3  ;;  %626 = vst.msk [vmem:[#allocation2] sm:$0xff] (!%p242_p9), %vm413_vm0, %v2179_v3  ;;  %s3109_s9 = smov (!%p242_p9), 64   ;;  %s3112_s13 = smov (!%p242_p9), 8   ;;  %vm763_vm4 = vcmask (!%p242_p9), 195712   ;;  %vm812_vm5 = vcmask (!%p242_p9), 261312  }
  0x10   : > { %1913 = vmatprep.subr.bf16.mxu0 (!%p242_p9), %v2008_v1  ;;  %629 = vst.msk [vmem:[#allocation2 + $0x10] sm:$0xff] (!%p242_p9), %vm413_vm0, %v2179_v3  ;;  %631 = vst.msk [vmem:[#allocation2 + $0x20] sm:$0xff] (!%p242_p9), %vm413_vm0, %v2179_v3  ;;  %s3099_s14 = smov (!%p242_p9), 72   ;;  %s2184_s16 = smov (!%p242_p9), 80   ;;  %vm861_vm6 = vcmask (!%p242_p9), 326912   ;;  %vm910_vm7 = vcmask (!%p242_p9), 392512  }
  0x11   : > { %633 = vst.msk [vmem:[#allocation2 + $0x30] sm:$0xff] (!%p242_p9), %vm413_vm0, %v2179_v3  ;;  %635 = vst.msk [vmem:[#allocation2 + $0x40] sm:$0xff] (!%p242_p9), %vm413_vm0, %v2179_v3  ;;  %s3107_s17 = smov (!%p242_p9), 24   ;;  %s2186_s18 = smov (!%p242_p9), 88   ;;  %vm959_vm8 = vcmask (!%p242_p9), 458112   ;;  %vm1008_vm9 = vcmask (!%p242_p9), 523712  }
  0x12   : > { %637 = vst.msk [vmem:[#allocation2 + $0x50] sm:$0xff] (!%p242_p9), %vm413_vm0, %v2179_v3  ;;  %639 = vst.msk [vmem:[#allocation2 + $0x60] sm:$0xff] (!%p242_p9), %vm413_vm0, %v2179_v3  ;;  %s3103_s19 = smov (!%p242_p9), 96   ;;  %s2189_s21 = smov (!%p242_p9), 112   ;;  %vm1058_vm10 = vcmask (!%p242_p9), 589312   ;;  %vm1107_vm11 = vcmask (!%p242_p9), 654912  }
  0x13   : > { %641 = vst.msk [vmem:[#allocation2 + $0x70] sm:$0xff] (!%p242_p9), %vm413_vm0, %v2179_v3  ;;  %643 = vst.msk [vmem:[#allocation2 + $0x80] sm:$0xff] (!%p242_p9), %vm413_vm0, %v2179_v3  ;;  %1914 = vmatpush3.bf16.msra.mxu0 (!%p242_p9), %v2008_v1  ;;  %s3101_s22 = smov (!%p242_p9), 32   ;;  %s3111_s23 = smov (!%p242_p9), 40   ;;  %vm1156_vm12 = vcmask (!%p242_p9), 720512   ;;  %vm1205_vm13 = vcmask (!%p242_p9), 786112  }
  0x14   : > { %647 = vst.msk [vmem:[#allocation2 + $0xa0] sm:$0xff] (!%p242_p9), %vm413_vm0, %v2179_v3  ;;  %1915 = vmatprep.subr.bf16.mxu0 (!%p242_p9), %v2009_v2  ;;  %s3108_s29 = smov (!%p242_p9), 48   ;;  %vm1255_vm14 = vcmask (!%p242_p9), 851712   ;;  %vm1304_vm15 = vcmask (!%p242_p9), 917312  }
  0x15   : > { %s3130_s15 = smov (!%p274_p10, %s1839_s15), 15  ;;  %646 = vst.msk [vmem:[#allocation2 + $0x98] sm:$0x7] %vm627_vm1, %v2179_v3  ;;  %628 = vst.msk [vmem:[#allocation2 + $0x8] sm:$0x7] %vm627_vm1, %v2179_v3 }
  0x16   : > { %s1840_s20 = sshll.u32 %s3130_s15, 3  ;;  %630 = vst.msk [vmem:[#allocation2 + $0x18] sm:$0x7] %vm627_vm1, %v2179_v3  ;;  %632 = vst.msk [vmem:[#allocation2 + $0x28] sm:$0x7] %vm627_vm1, %v2179_v3  ;;  %v1025_v18 = vld [vmem:[#allocation2 + $0x90] sm:$0xff] }
  0x17   : > { %634 = vst.msk [vmem:[#allocation2 + $0x38] sm:$0x7] %vm627_vm1, %v2179_v3  ;;  %636 = vst.msk [vmem:[#allocation2 + $0x48] sm:$0x7] %vm627_vm1, %v2179_v3  ;;  %s277_s8 = scalar_lea.vmem %s3091_s0, %s1840_s20  ;;  %1916 = vmatpush3.bf16.msra.mxu0 %v2009_v2  ;;  %1048 = vrot.lane.b32.xlu1 %v1025_v18, %s3109_s9  ;;  %s2183_s15 = smov 16   ;;  %v658_v36 = vld [vmem:[#allocation2] sm:$0xff] }
  0x18   : > { %638 = vst.msk [vmem:[#allocation2 + $0x58] sm:$0x7] %vm627_vm1, %v2179_v3  ;;  %640 = vst.msk [vmem:[#allocation2 + $0x68] sm:$0x7] %vm627_vm1, %v2179_v3  ;;  %v281_v5 = vld [vmem:[%s277_s8] sm:$0xff]  ;;  %v282_v6 = vld [vmem:[%s277_s8 + $0x8] sm:$0xff]  ;;  %1917 = vmatprep.subr.bf16.mxu0 %v2010_v4 }
  0x19   : > { %642 = vst.msk [vmem:[#allocation2 + $0x78] sm:$0x7] %vm627_vm1, %v2179_v3  ;;  %644 = vst.msk [vmem:[#allocation2 + $0x88] sm:$0x7] %vm627_vm1, %v2179_v3  ;;  %v283_v7 = vld [vmem:[%s277_s8 + $0x10] sm:$0xff]  ;;  %v1841_v8 = vadd.f32 -0.5, %v281_v5 }
  0x1a   : > { %648 = vst.msk [vmem:[#allocation2 + $0xa8] sm:$0x7] %vm627_vm1, %v2179_v3  ;;  %v1842_v9 = vadd.f32 -0.5, %v282_v6  ;;  %v284_v10 = vld [vmem:[%s277_s8 + $0x18] sm:$0xff]  ;;  %v285_v11 = vld [vmem:[%s277_s8 + $0x20] sm:$0xff]  ;;  %v286_v12 = vld [vmem:[%s277_s8 + $0x28] sm:$0xff] }
  0x1b   : > { %v1843_v14 = vadd.f32 -0.5, %v283_v7  ;;  %v1844_v15 = vadd.f32 -0.5, %v284_v10  ;;  %v1845_v16 = vadd.f32 -0.5, %v285_v11  ;;  %v1846_v17 = vadd.f32 -0.5, %v286_v12  ;;  %v287_v21 = vld [vmem:[%s277_s8 + $0x30] sm:$0xff]  ;;  %v288_v22 = vld [vmem:[%s277_s8 + $0x38] sm:$0xff]  ;;  %1918 = vmatpush3.bf16.msra.mxu0 %v2010_v4 }
  0x1c   : > { %v297_v13 = vpack.c.bf16 %v1842_v9, %v1841_v8  ;;  %v674_v19 = vld [vmem:[#allocation2 + $0x1] sm:$0xff]  ;;  %v1074_v23 = vld [vmem:[#allocation2 + $0x91] sm:$0xff]  ;;  %v1847_v26 = vadd.f32 -0.5, %v287_v21  ;;  %v1848_v27 = vadd.f32 -0.5, %v288_v22  ;;  %s2188_s20 = smov 104   ;;  %666 = vst.msk [vmem:[#allocation3] sm:$0xff] %vm413_vm0, %v658_v36 }
  0x1d   : > { %v298_v20 = vpack.c.bf16 %v1844_v15, %v1843_v14  ;;  %690 = vrot.lane.b32.xlu0 %v674_v19, %s3112_s13  ;;  %v299_v24 = vpack.c.bf16 %v1846_v17, %v1845_v16  ;;  %v723_v25 = vld [vmem:[#allocation2 + $0x2] sm:$0xff]  ;;  %1097 = vrot.lane.b32.xlu1 %v1074_v23, %s3099_s14  ;;  %v1123_v28 = vld [vmem:[#allocation2 + $0x92] sm:$0xff]  ;;  %s3110_s8 = smov 56   ;;  %vm1402_vm1 = vcmask 1048512  }
  0x1e   : > { %1919 = vmatprep.mubr.msk.bf16.mxu0 %vm333_vm2, %v297_v13  ;;  %v772_v29 = vld [vmem:[#allocation2 + $0x3] sm:$0xff]  ;;  %v300_v30 = vpack.c.bf16 %v1848_v27, %v1847_v26  ;;  %v1172_v31 = vld [vmem:[#allocation2 + $0x93] sm:$0xff] }
  0x1f   : > { %1920 = vmatmul.mubr.msk.bf16.vlgmr.msra.gmra.mrb[0].mxu0 %vm333_vm2, %v298_v20  ;;  %v1222_v32 = vld [vmem:[#allocation2 + $0xa0] sm:$0xff] }
  0x20   : > { %1923 = vmatprep.mubr.msk.bf16.mxu0 %vm333_vm2, %v299_v24 }
  0x21   : > { %739 = vrot.lane.b32.xlu0 %v723_v25, %s2183_s15  ;;  %1146 = vrot.lane.b32.xlu1 %v1123_v28, %s2184_s16  ;;  %v1271_v33 = vld [vmem:[#allocation2 + $0xa1] sm:$0xff] }
  0x22   : > { %v1320_v34 = vld [vmem:[#allocation2 + $0xa2] sm:$0xff] }
  0x25   : > { %788 = vrot.lane.b32.xlu0 %v772_v29, %s3107_s17  ;;  %1195 = vrot.lane.b32.xlu1 %v1172_v31, %s2186_s18 }
  0x27   : > { %1924 = vmatmul.mubr.msk.bf16.gmra.mrb[4].mxu0 %vm333_vm2, %v300_v30 }
  0x29   : > { %1243 = vrot.lane.b32.xlu0 %v1025_v18, %s3103_s19  ;;  %1245 = vrot.lane.b32.xlu1 %v1222_v32, %s3103_s19 }
  0x2d   : > { %1292 = vrot.lane.b32.xlu0 %v1074_v23, %s2188_s20  ;;  %1294 = vrot.lane.b32.xlu1 %v1271_v33, %s2188_s20 }
  0x31   : > { %1341 = vrot.lane.b32.xlu0 %v1123_v28, %s2189_s21  ;;  %1343 = vrot.lane.b32.xlu1 %v1320_v34, %s2189_s21 }
  0x89   : > { %v2403_v7 = vpop.permute.xlu1 %1048 }
  0x8f   : > { %v691_v35 = vpop.permute.xlu0 %690  ;;  %v2405_v8 = vpop.permute.xlu1 %1097 }
  0x90   : > { %715 = vst.msk [vmem:[#allocation3] sm:$0xff] %vm714_vm3, %v691_v35 }
  0x93   : > { %v740_v37 = vpop.permute.xlu0 %739  ;;  %v2407_v9 = vpop.permute.xlu1 %1146 }
  0x94   : > { %764 = vst.msk [vmem:[#allocation3] sm:$0xff] %vm763_vm4, %v740_v37 }
  0x97   : > { %v789_v38 = vpop.permute.xlu0 %788  ;;  %v2409_v10 = vpop.permute.xlu1 %1195 }
  0x98   : > { %813 = vst.msk [vmem:[#allocation3] sm:$0xff] %vm812_vm5, %v789_v38 }
  0x9b   : > { %v2411_v11 = vpop.permute.xlu1 %1245  ;;  %v2413_v12 = vpop.permute.xlu0 %1243 }
  0x9f   : > { %v2415_v13 = vpop.permute.xlu1 %1294  ;;  %v2417_v14 = vpop.permute.xlu0 %1292 }
  0xa3   : > { %v2419_v15 = vpop.permute.xlu1 %1343  ;;  %v2421_v16 = vpop.permute.xlu0 %1341 }
  0xf2   : > { %v2347_v39 = vpop.f32.mrb[0].mxu0 }
  0xf3   : > { %v2349_v40 = vpop.f32.mrb[1].mxu0  ;;  %v420_v41 = vsel %vm413_vm0, %v2347_v39, 0.0  ;;  %v448_v42 = vmul.f32 %v2347_v39, %v2347_v39 }
  0xf4   : > { %421 = vadd.xlane.f32.xlu1 %v420_v41  ;;  %v2355_v43 = vpop.f32.mrb[2].mxu0  ;;  %v414_v44 = vsel %vm413_vm0, %v2349_v40, 0.0  ;;  %v446_v47 = vmul.f32 %v2349_v40, %v2349_v40 }
  0xf5   : > { %415 = vadd.xlane.f32.xlu0 %v414_v44  ;;  %v2359_v45 = vpop.f32.mrb[3].mxu0  ;;  %v460_v46 = vsel %vm413_vm0, %v448_v42, 0.0  ;;  %v423_v48 = vsel %vm413_vm0, %v2355_v43, 0.0  ;;  %v449_v51 = vmul.f32 %v2355_v43, %v2355_v43 }
  0xf6   : > { %v454_v50 = vsel %vm413_vm0, %v446_v47, 0.0  ;;  %v417_v53 = vsel %vm413_vm0, %v2359_v45, 0.0  ;;  %v447_v54 = vmul.f32 %v2359_v45, %v2359_v45 }
  0xf7   : > { %v463_v58 = vsel %vm413_vm0, %v449_v51, 0.0 }
  0xf8   : > { %461 = vadd.xlane.f32.xlu1 %v460_v46  ;;  %v457_v59 = vsel %vm413_vm0, %v447_v54, 0.0 }
  0xf9   : > { %424 = vadd.xlane.f32.xlu0 %v423_v48 }
  0xfa   : > { %v2366_v49 = vpop.f32.mrb[4].mxu0 }
  0xfb   : > { %v2371_v52 = vpop.f32.mrb[5].mxu0  ;;  %v452_v56 = vmul.f32 %v2366_v49, %v2366_v49  ;;  %v432_v61 = vsel %vm413_vm0, %v2366_v49, 0.0 }
  0xfc   : > { %455 = vadd.xlane.f32.xlu1 %v454_v50  ;;  %v2377_v55 = vpop.f32.mrb[6].mxu0  ;;  %v450_v63 = vmul.f32 %v2371_v52, %v2371_v52  ;;  %v426_v0 = vsel %vm413_vm0, %v2371_v52, 0.0 }
  0xfd   : > { %418 = vadd.xlane.f32.xlu0 %v417_v53  ;;  %v2381_v57 = vpop.f32.mrb[7].mxu0  ;;  %v472_v60 = vsel %vm413_vm0, %v452_v56, 0.0  ;;  %v453_v2 = vmul.f32 %v2377_v55, %v2377_v55  ;;  %v435_v4 = vsel %vm413_vm0, %v2377_v55, 0.0 }
  0xfe   : > { %v429_v62 = vsel %vm413_vm0, %v2381_v57, 0.0  ;;  %v466_v1 = vsel %vm413_vm0, %v450_v63, 0.0  ;;  %v451_v3 = vmul.f32 %v2381_v57, %v2381_v57 }
  0xff   : > { %v475_v5 = vsel %vm413_vm0, %v453_v2, 0.0 }
 0x100   : > { %464 = vadd.xlane.f32.xlu1 %v463_v58  ;;  %v469_v6 = vsel %vm413_vm0, %v451_v3, 0.0 }
 0x101   : > { %458 = vadd.xlane.f32.xlu0 %v457_v59 }
 0x104   : > { %473 = vadd.xlane.f32.xlu1 %v472_v60 }
 0x105   : > { %433 = vadd.xlane.f32.xlu0 %v432_v61 }
 0x108   : > { %430 = vadd.xlane.f32.xlu1 %v429_v62 }
 0x109   : > { %427 = vadd.xlane.f32.xlu0 %v426_v0 }
 0x10c   : > { %467 = vadd.xlane.f32.xlu1 %v466_v1 }
 0x10d   : > { %436 = vadd.xlane.f32.xlu0 %v435_v4  ;;  %v2441_v4 = vld [vmem:[%s3093_s2] ss:$0 sm:$0xff] }
 0x110   : > { %476 = vadd.xlane.f32.xlu1 %v475_v5 }
 0x111   : > { %470 = vadd.xlane.f32.xlu0 %v469_v6 }
 0x181   : > { %v422_v17 = vpop.xlane.xlu1 %421 }
 0x182   : > { %v440_v18 = vmul.f32 0.125, %v422_v17  ;;  %v416_v19 = vpop.xlane.xlu0 %415 }
 0x183   : > { %v438_v22 = vmul.f32 0.125, %v416_v19 }
 0x184   : > { %v488_v21 = vmul.f32 %v440_v18, %v440_v18  ;;  %v512_v0 = vsub.f32 %v2347_v39, %v440_v18  ;;  %v2448_v39 = vld [vmem:[%s3094_s3] ss:$0 sm:$0xff] }
 0x185   : > { %v462_v20 = vpop.xlane.xlu1 %461  ;;  %v486_v27 = vmul.f32 %v438_v22, %v438_v22 }
 0x186   : > { %v480_v23 = vmul.f32 0.125, %v462_v20  ;;  %v425_v24 = vpop.xlane.xlu0 %424 }
 0x187   : > { %v2423_v29 = vmul.f32 0.125, %v425_v24 }
 0x188   : > { %v496_v25 = vsub.f32 %v480_v23, %v488_v21  ;;  %v510_v23 = vsub.f32 %v2349_v40, %v438_v22 }
 0x189   : > { %v456_v26 = vpop.xlane.xlu1 %455  ;;  %v489_v36 = vmul.f32 %v2423_v29, %v2423_v29 }
 0x18a   : > { %v504_v28 = vmax.f32 %v496_v25, 0.0  ;;  %v478_v30 = vmul.f32 0.125, %v456_v26  ;;  %v419_v31 = vpop.xlane.xlu0 %418 }
 0x18b   : > { %v2425_v32 = vmul.f32 0.125, %v419_v31 }
 0x18c   : > { %v520_v33 = vadd.f32 0.001, %v504_v28  ;;  %v494_v34 = vsub.f32 %v478_v30, %v486_v27 }
 0x18d   : > { %v465_v35 = vpop.xlane.xlu1 %464  ;;  %v487_v42 = vmul.f32 %v2425_v32, %v2425_v32 }
 0x18e   : > { %2019 = vrsqrt.f32 %v520_v33  ;;  %v502_v37 = vmax.f32 %v494_v34, 0.0  ;;  %v481_v38 = vmul.f32 0.125, %v465_v35  ;;  %v459_v41 = vpop.xlane.xlu0 %458 }
 0x18f   : > { %v479_v44 = vmul.f32 0.125, %v459_v41 }
 0x190   : > { %v518_v46 = vadd.f32 0.001, %v502_v37  ;;  %v497_v47 = vsub.f32 %v481_v38, %v489_v36  ;;  %v513_v38 = vsub.f32 %v2355_v43, %v2423_v29 }
 0x191   : > { %v495_v48 = vsub.f32 %v479_v44, %v487_v42  ;;  %v474_v50 = vpop.xlane.xlu1 %473 }
 0x192   : > { %2021 = vrsqrt.f32 %v518_v46  ;;  %v505_v51 = vmax.f32 %v497_v47, 0.0  ;;  %v434_v53 = vpop.xlane.xlu0 %433  ;;  %v484_v56 = vmul.f32 0.125, %v474_v50  ;;  %v511_v46 = vsub.f32 %v2359_v45, %v2425_v32 }
 0x193   : > { %v503_v54 = vmax.f32 %v495_v48, 0.0  ;;  %v2431_v58 = vmul.f32 0.125, %v434_v53 }
 0x194   : > { %v521_v59 = vadd.f32 0.001, %v505_v51 }
 0x195   : > { %v519_v60 = vadd.f32 0.001, %v503_v54  ;;  %v492_v61 = vmul.f32 %v2431_v58, %v2431_v58  ;;  %v431_v62 = vpop.xlane.xlu1 %430 }
 0x196   : > { %2023 = vrsqrt.f32 %v521_v59  ;;  %v428_v63 = vpop.xlane.xlu0 %427  ;;  %v2450_v18 = vmul.f32 0.125, %v431_v62 }
 0x197   : > { %2025 = vrsqrt.f32 %v519_v60  ;;  %v500_v1 = vsub.f32 %v484_v56, %v492_v61  ;;  %v2436_v2 = vmul.f32 0.125, %v428_v63 }
 0x198   : > { %v2020_v3 = vpop.eup %2019  ;;  %v491_v28 = vmul.f32 %v2450_v18, %v2450_v18 }
 0x199   : > { %v536_v5 = vmul.f32 %v2020_v3, %v512_v0  ;;  %v508_v6 = vmax.f32 %v500_v1, 0.0  ;;  %v490_v17 = vmul.f32 %v2436_v2, %v2436_v2  ;;  %v468_v19 = vpop.xlane.xlu1 %467  ;;  %v516_v0 = vsub.f32 %v2366_v49, %v2431_v58 }
 0x19a   : > { %v482_v20 = vmul.f32 0.125, %v468_v19  ;;  %v437_v21 = vpop.xlane.xlu0 %436 }
 0x19b   : > { %v550_v24 = vmul.f32 %v2441_v4, %v536_v5  ;;  %v524_v25 = vadd.f32 0.001, %v508_v6  ;;  %v2454_v26 = vmul.f32 0.125, %v437_v21 }
 0x19c   : > { %v2022_v27 = vpop.eup %2021  ;;  %v498_v30 = vsub.f32 %v482_v20, %v490_v17  ;;  %v514_v20 = vsub.f32 %v2371_v52, %v2436_v2  ;;  %v515_v52 = vsub.f32 %v2381_v57, %v2450_v18 }
 0x19d   : > { %v2459_v31 = vadd.f32 %v2448_v39, %v550_v24  ;;  %v534_v33 = vmul.f32 %v2022_v27, %v510_v23  ;;  %2027 = vrsqrt.f32 %v524_v25  ;;  %v493_v34 = vmul.f32 %v2454_v26, %v2454_v26  ;;  %v477_v35 = vpop.xlane.xlu1 %476 }
 0x19e   : > { %v506_v40 = vmax.f32 %v498_v30, 0.0  ;;  %v485_v22 = vmul.f32 0.125, %v477_v35  ;;  %v471_v36 = vpop.xlane.xlu0 %470 }
 0x19f   : > { %v1861_v37 = vmul.f32 -1.442695, %v2459_v31  ;;  %v548_v41 = vmul.f32 %v2441_v4, %v534_v33  ;;  %v483_v42 = vmul.f32 0.125, %v471_v36 }
 0x1a0   : > { %v2024_v44 = vpop.eup %2023  ;;  %v522_v47 = vadd.f32 0.001, %v506_v40  ;;  %v501_v48 = vsub.f32 %v485_v22, %v493_v34 }
 0x1a1   : > { %v2026_v50 = vpop.eup %2025  ;;  %2029 = vpow2.f32 %v1861_v37  ;;  %v2470_v51 = vadd.f32 %v2448_v39, %v548_v41  ;;  %v537_v53 = vmul.f32 %v2024_v44, %v513_v38  ;;  %v499_v54 = vsub.f32 %v483_v42, %v491_v28 }
 0x1a2   : > { %v535_v56 = vmul.f32 %v2026_v50, %v511_v46  ;;  %2031 = vrsqrt.f32 %v522_v47  ;;  %v509_v59 = vmax.f32 %v501_v48, 0.0  ;;  %v517_v28 = vsub.f32 %v2377_v55, %v2454_v26 }
 0x1a3   : > { %v1859_v43 = vmul.f32 -1.442695, %v2470_v51  ;;  %v551_v29 = vmul.f32 %v2441_v4, %v537_v53  ;;  %v507_v60 = vmax.f32 %v499_v54, 0.0 }
 0x1a4   : > { %v549_v61 = vmul.f32 %v2441_v4, %v535_v56  ;;  %v525_v45 = vadd.f32 0.001, %v509_v59 }
 0x1a5   : > { %2033 = vpow2.f32 %v1859_v43  ;;  %v565_v32 = vadd.f32 %v2448_v39, %v551_v29  ;;  %v523_v62 = vadd.f32 0.001, %v507_v60 }
 0x1a6   : > { %v563_v63 = vadd.f32 %v2448_v39, %v549_v61  ;;  %2035 = vrsqrt.f32 %v525_v45 }
 0x1a7   : > { %v2028_v1 = vpop.eup %2027  ;;  %v1862_v3 = vmul.f32 -1.442695, %v565_v32  ;;  %2037 = vrsqrt.f32 %v523_v62 }
 0x1a8   : > { %v1860_v5 = vmul.f32 -1.442695, %v563_v63  ;;  %v540_v6 = vmul.f32 %v2028_v1, %v516_v0 }
 0x1a9   : > { %2039 = vpow2.f32 %v1862_v3 }
 0x1aa   : > { %2041 = vpow2.f32 %v1860_v5  ;;  %v554_v17 = vmul.f32 %v2441_v4, %v540_v6 }
 0x1ab   : > { %v2030_v19 = vpop.eup %2029 }
 0x1ac   : > { %v2032_v21 = vpop.eup %2031  ;;  %v596_v23 = vadd.f32 1.0, %v2030_v19  ;;  %v2483_v24 = vadd.f32 %v2448_v39, %v554_v17 }
 0x1ad   : > { %v538_v49 = vmul.f32 %v2032_v21, %v514_v20 }
 0x1ae   : > { %2043 = vrcp.f32 %v596_v23  ;;  %v1865_v58 = vmul.f32 -1.442695, %v2483_v24 }
 0x1af   : > { %v2034_v25 = vpop.eup %2033  ;;  %v552_v27 = vmul.f32 %v2441_v4, %v538_v49 }
 0x1b0   : > { %v2036_v30 = vpop.eup %2035  ;;  %v594_v33 = vadd.f32 1.0, %v2034_v25  ;;  %2045 = vpow2.f32 %v1865_v58 }
 0x1b1   : > { %v2038_v2 = vpop.eup %2037  ;;  %v2492_v34 = vadd.f32 %v2448_v39, %v552_v27  ;;  %v541_v35 = vmul.f32 %v2036_v30, %v517_v28 }
 0x1b2   : > { %2047 = vrcp.f32 %v594_v33  ;;  %v539_v40 = vmul.f32 %v2038_v2, %v515_v52 }
 0x1b3   : > { %v2040_v22 = vpop.eup %2039  ;;  %v1863_v36 = vmul.f32 -1.442695, %v2492_v34  ;;  %v555_v37 = vmul.f32 %v2441_v4, %v541_v35 }
 0x1b4   : > { %v2042_v38 = vpop.eup %2041  ;;  %v597_v55 = vadd.f32 1.0, %v2040_v22  ;;  %v553_v26 = vmul.f32 %v2441_v4, %v539_v40 }
 0x1b5   : > { %v595_v41 = vadd.f32 1.0, %v2042_v38  ;;  %2049 = vpow2.f32 %v1863_v36  ;;  %v2498_v57 = vadd.f32 %v2448_v39, %v555_v37 }
 0x1b6   : > { %2051 = vrcp.f32 %v597_v55  ;;  %v2501_v18 = vadd.f32 %v2448_v39, %v553_v26 }
 0x1b7   : > { %2053 = vrcp.f32 %v595_v41  ;;  %v1866_v42 = vmul.f32 -1.442695, %v2498_v57 }
 0x1b8   : > { %v2044_v44 = vpop.eup %2043  ;;  %v1864_v46 = vmul.f32 -1.442695, %v2501_v18 }
 0x1b9   : > { %v620_v47 = vmul.f32 %v2044_v44, %v2459_v31  ;;  %2055 = vpow2.f32 %v1866_v42 }
 0x1ba   : > { %v2046_v48 = vpop.eup %2045  ;;  %2057 = vpow2.f32 %v1864_v46 }
 0x1bb   : > { %652 = vst.msk [vmem:[#allocation2 + $0x31] sm:$0xff] %vm413_vm0, %v620_v47  ;;  %v600_v4 = vadd.f32 1.0, %v2046_v48 }
 0x1bc   : > { %v2048_v50 = vpop.eup %2047 }
 0x1bd   : > { %v618_v53 = vmul.f32 %v2048_v50, %v2470_v51  ;;  %2059 = vrcp.f32 %v600_v4 }
 0x1bf   : > { %v2050_v39 = vpop.eup %2049  ;;  %650 = vst.msk [vmem:[#allocation2 + $0x11] sm:$0xff] %vm413_vm0, %v618_v53 }
 0x1c0   : > { %v2052_v54 = vpop.eup %2051  ;;  %v598_v56 = vadd.f32 1.0, %v2050_v39 }
 0x1c1   : > { %v2054_v59 = vpop.eup %2053  ;;  %v621_v43 = vmul.f32 %v2052_v54, %v565_v32 }
 0x1c2   : > { %v619_v29 = vmul.f32 %v2054_v59, %v563_v63  ;;  %2061 = vrcp.f32 %v598_v56  ;;  %v823_v31 = vld [vmem:[#allocation2 + $0x30] sm:$0xff] }
 0x1c3   : > { %v677_v60 = vld [vmem:[#allocation2 + $0x31] sm:$0xff]  ;;  %v2056_v61 = vpop.eup %2055  ;;  %653 = vst.msk [vmem:[#allocation2 + $0x41] sm:$0xff] %vm413_vm0, %v621_v43  ;;  %841 = vrot.lane.b32.xlu0 %v823_v31, %s3101_s22  ;;  %669 = vst.msk [vmem:[#allocation3 + $0x18] sm:$0xff] %vm413_vm0, %v823_v31 }
 0x1c4   : > { %696 = vrot.lane.b32.xlu1 %v677_v60, %s3112_s13  ;;  %v2058_v51 = vpop.eup %2057  ;;  %651 = vst.msk [vmem:[#allocation2 + $0x21] sm:$0xff] %vm413_vm0, %v619_v29  ;;  %v601_v45 = vadd.f32 1.0, %v2056_v61  ;;  %v726_v32 = vld [vmem:[#allocation2 + $0x32] sm:$0xff] }
 0x1c5   : > { %v599_v62 = vadd.f32 1.0, %v2058_v51  ;;  %v775_v3 = vld [vmem:[#allocation2 + $0x33] sm:$0xff] }
 0x1c6   : > { %2063 = vrcp.f32 %v601_v45  ;;  %v821_v63 = vld [vmem:[#allocation2 + $0x10] sm:$0xff] }
 0x1c7   : > { %v2060_v0 = vpop.eup %2059  ;;  %2065 = vrcp.f32 %v599_v62  ;;  %890 = vrot.lane.b32.xlu0 %v677_v60, %s3111_s23  ;;  %667 = vst.msk [vmem:[#allocation3 + $0x8] sm:$0xff] %vm413_vm0, %v821_v63  ;;  %v675_v27 = vld [vmem:[#allocation2 + $0x11] sm:$0xff] }
 0x1c8   : > { %745 = vrot.lane.b32.xlu1 %v726_v32, %s2183_s15  ;;  %v624_v1 = vmul.f32 %v2060_v0, %v2483_v24  ;;  %v724_v28 = vld [vmem:[#allocation2 + $0x12] sm:$0xff] }
 0x1c9   : > { %v773_v30 = vld [vmem:[#allocation2 + $0x13] sm:$0xff] }
 0x1ca   : > { %656 = vst.msk [vmem:[#allocation2 + $0x71] sm:$0xff] %vm413_vm0, %v624_v1  ;;  %v824_v5 = vld [vmem:[#allocation2 + $0x40] sm:$0xff] }
 0x1cb   : > { %939 = vrot.lane.b32.xlu0 %v726_v32, %s3108_s29  ;;  %670 = vst.msk [vmem:[#allocation3 + $0x20] sm:$0xff] %vm413_vm0, %v824_v5  ;;  %v822_v17 = vld [vmem:[#allocation2 + $0x20] sm:$0xff] }
 0x1cc   : > { %794 = vrot.lane.b32.xlu1 %v775_v3, %s3107_s17  ;;  %v2062_v6 = vpop.eup %2061  ;;  %668 = vst.msk [vmem:[#allocation3 + $0x10] sm:$0xff] %vm413_vm0, %v822_v17  ;;  %v873_v33 = vld [vmem:[#allocation2 + $0x41] sm:$0xff] }
 0x1cd   : > { %v622_v19 = vmul.f32 %v2062_v6, %v2492_v34  ;;  %v922_v52 = vld [vmem:[#allocation2 + $0x42] sm:$0xff] }
 0x1ce   : > { %v971_v2 = vld [vmem:[#allocation2 + $0x43] sm:$0xff] }
 0x1cf   : > { %654 = vst.msk [vmem:[#allocation2 + $0x51] sm:$0xff] %vm413_vm0, %v622_v19  ;;  %988 = vrot.lane.b32.xlu0 %v775_v3, %s3110_s8  ;;  %v676_v34 = vld [vmem:[#allocation2 + $0x21] sm:$0xff] }
 0x1d0   : > { %1036 = vrot.lane.b32.xlu1 %v823_v31, %s3109_s9  ;;  %v2064_v20 = vpop.eup %2063  ;;  %v725_v35 = vld [vmem:[#allocation2 + $0x22] sm:$0xff] }
 0x1d1   : > { %v2066_v21 = vpop.eup %2065  ;;  %v625_v23 = vmul.f32 %v2064_v20, %v2498_v57  ;;  %v2528_v24 = vld [vmem:[#allocation2 + $0x70] sm:$0xff]  ;;  %v774_v40 = vld [vmem:[#allocation2 + $0x23] sm:$0xff] }
 0x1d2   : > { %v623_v49 = vmul.f32 %v2066_v21, %v2501_v18  ;;  %673 = vst.msk [vmem:[#allocation3 + $0x38] sm:$0xff] %vm413_vm0, %v2528_v24  ;;  %v681_v22 = vld [vmem:[#allocation2 + $0x71] sm:$0xff]  ;;  %v2011_v20 = vld [vmem:[%s3095_s4] sm:$0xff]  }
 0x1d3   : > { %657 = vst.msk [vmem:[#allocation2 + $0x81] sm:$0xff] %vm413_vm0, %v625_v23  ;;  %1231 = vrot.lane.b32.xlu0 %v823_v31, %s3103_s19  ;;  %v730_v36 = vld [vmem:[#allocation2 + $0x72] sm:$0xff]  ;;  %1927 = vmatprep.subr.bf16.mxu1 %v2011_v20 }
 0x1d4   : > { %1085 = vrot.lane.b32.xlu1 %v677_v60, %s3099_s14  ;;  %655 = vst.msk [vmem:[#allocation2 + $0x61] sm:$0xff] %vm413_vm0, %v623_v49  ;;  %s3105_s14 = smov 120   ;;  %v2585_v37 = vld [vmem:[#allocation2 + $0x73] sm:$0xff]  ;;  %1928 = vmatpush3.bf16.msra.mxu1 %v2011_v20 }
 0x1d6   : > { %v2537_v58 = vld [vmem:[#allocation2 + $0x50] sm:$0xff] }
 0x1d7   : > { %1280 = vrot.lane.b32.xlu0 %v677_v60, %s2188_s20  ;;  %671 = vst.msk [vmem:[#allocation3 + $0x28] sm:$0xff] %vm413_vm0, %v2537_v58  ;;  %v679_v57 = vld [vmem:[#allocation2 + $0x51] sm:$0xff] }
 0x1d8   : > { %1134 = vrot.lane.b32.xlu1 %v726_v32, %s2184_s16  ;;  %v728_v47 = vld [vmem:[#allocation2 + $0x52] sm:$0xff] }
 0x1d9   : > { %v777_v39 = vld [vmem:[#allocation2 + $0x53] sm:$0xff] }
 0x1da   : > { %v828_v60 = vld [vmem:[#allocation2 + $0x80] sm:$0xff] }
 0x1db   : > { %1329 = vrot.lane.b32.xlu0 %v726_v32, %s2189_s21  ;;  %v2545_v25 = vld [vmem:[#allocation2 + $0x60] sm:$0xff] }
 0x1dc   : > { %1183 = vrot.lane.b32.xlu1 %v775_v3, %s2186_s18  ;;  %672 = vst.msk [vmem:[#allocation3 + $0x30] sm:$0xff] %vm413_vm0, %v2545_v25  ;;  %v877_v45 = vld [vmem:[#allocation2 + $0x81] sm:$0xff]  ;;  %vm1353_vm0 = vcmask 982912  }
 0x1df   : > { %1378 = vrot.lane.b32.xlu0 %v775_v3, %s3105_s14  ;;  %v2662_v3 = vld [vmem:[#allocation2 + $0x83] sm:$0xff] }
 0x1e0   : > { %692 = vrot.lane.b32.xlu1 %v675_v27, %s3112_s13 }
 0x1e3   : > { %837 = vrot.lane.b32.xlu0 %v821_v63, %s3101_s22  ;;  %v926_v63 = vld [vmem:[#allocation2 + $0x82] sm:$0xff] }
 0x1e4   : > { %741 = vrot.lane.b32.xlu1 %v724_v28, %s2183_s15 }
 0x1e7   : > { %886 = vrot.lane.b32.xlu0 %v675_v27, %s3111_s23  ;;  %v680_v27 = vld [vmem:[#allocation2 + $0x61] sm:$0xff] }
 0x1e8   : > { %790 = vrot.lane.b32.xlu1 %v773_v30, %s3107_s17 }
 0x1eb   : > { %935 = vrot.lane.b32.xlu0 %v724_v28, %s3108_s29  ;;  %v2013_v28 = vld [vmem:[%s3095_s4 + $0x10] sm:$0xff]  }
 0x1ec   : > { %843 = vrot.lane.b32.xlu1 %v824_v5, %s3101_s22  ;;  %s3115_s22 = smov 72  }
 0x1ef   : > { %984 = vrot.lane.b32.xlu0 %v773_v30, %s3110_s8 }
 0x1f0   : > { %892 = vrot.lane.b32.xlu1 %v873_v33, %s3111_s23 }
 0x1f3   : > { %698 = vrot.lane.b32.xlu0 %v873_v33, %s3112_s13 }
 0x1f4   : > { %941 = vrot.lane.b32.xlu1 %v922_v52, %s3108_s29 }
 0x1f7   : > { %1038 = vrot.lane.b32.xlu0 %v824_v5, %s3109_s9 }
 0x1f8   : > { %990 = vrot.lane.b32.xlu1 %v971_v2, %s3110_s8 }
 0x1fb   : > { %747 = vrot.lane.b32.xlu0 %v922_v52, %s2183_s15 }
 0x1fc   : > { %1233 = vrot.lane.b32.xlu1 %v824_v5, %s3103_s19  ;;  %s3116_s19 = smov 32  }
 0x1ff   : > { %1087 = vrot.lane.b32.xlu0 %v873_v33, %s3115_s22 }
 0x200   : > { %1282 = vrot.lane.b32.xlu1 %v873_v33, %s2188_s20 }
 0x203   : > { %796 = vrot.lane.b32.xlu0 %v971_v2, %s3107_s17 }
 0x204   : > { %1331 = vrot.lane.b32.xlu1 %v922_v52, %s2189_s21 }
 0x207   : > { %1136 = vrot.lane.b32.xlu0 %v922_v52, %s2184_s16  ;;  %v729_v52 = vld [vmem:[#allocation2 + $0x62] sm:$0xff] }
 0x208   : > { %1380 = vrot.lane.b32.xlu1 %v971_v2, %s3105_s14  ;;  %s3117_s14 = smov 96  }
 0x20b   : > { %1185 = vrot.lane.b32.xlu0 %v971_v2, %s2186_s18  ;;  %v2014_v2 = vld [vmem:[%s3095_s4 + $0x18] sm:$0xff]  }
 0x20c   : > { %694 = vrot.lane.b32.xlu1 %v676_v34, %s3112_s13 }
 0x20f   : > { %743 = vrot.lane.b32.xlu0 %v725_v35, %s2183_s15 }
 0x210   : > { %839 = vrot.lane.b32.xlu1 %v822_v17, %s3116_s19 }
 0x213   : > { %792 = vrot.lane.b32.xlu0 %v774_v40, %s3107_s17 }
 0x214   : > { %888 = vrot.lane.b32.xlu1 %v676_v34, %s3111_s23 }
 0x217   : > { %1034 = vrot.lane.b32.xlu0 %v822_v17, %s3109_s9 }
 0x218   : > { %937 = vrot.lane.b32.xlu1 %v725_v35, %s3108_s29 }
 0x21b   : > { %1083 = vrot.lane.b32.xlu0 %v676_v34, %s3115_s22 }
 0x21c   : > { %986 = vrot.lane.b32.xlu1 %v774_v40, %s3110_s8 }
 0x21f   : > { %1132 = vrot.lane.b32.xlu0 %v725_v35, %s2184_s16 }
 0x220   : > { %704 = vrot.lane.b32.xlu1 %v681_v22, %s3112_s13 }
 0x223   : > { %1181 = vrot.lane.b32.xlu0 %v774_v40, %s2186_s18  ;;  %v778_v40 = vld [vmem:[#allocation2 + $0x63] sm:$0xff] }
 0x224   : > { %753 = vrot.lane.b32.xlu1 %v730_v36, %s2183_s15 }
 0x227   : > { %849 = vrot.lane.b32.xlu0 %v2528_v24, %s3116_s19 }
 0x228   : > { %802 = vrot.lane.b32.xlu1 %v2585_v37, %s3107_s17 }
 0x22b   : > { %898 = vrot.lane.b32.xlu0 %v681_v22, %s3111_s23 }
 0x22c   : > { %1044 = vrot.lane.b32.xlu1 %v2528_v24, %s3109_s9 }
 0x22f   : > { %947 = vrot.lane.b32.xlu0 %v730_v36, %s3108_s29 }
 0x230   : > { %1093 = vrot.lane.b32.xlu1 %v681_v22, %s3115_s22 }
 0x233   : > { %996 = vrot.lane.b32.xlu0 %v2585_v37, %s3110_s8 }
 0x234   : > { %1142 = vrot.lane.b32.xlu1 %v730_v36, %s2184_s16 }
 0x235   : > { %v2599_v38 = vpop.permute.xlu0 %841 }
 0x236   : > { %v697_v55 = vpop.permute.xlu1 %696 }
 0x237   : > { %718 = vst.msk [vmem:[#allocation3 + $0x18] sm:$0xff] %vm714_vm3, %v697_v55  ;;  %1239 = vrot.lane.b32.xlu0 %v2528_v24, %s3117_s14  ;;  %v2012_v24 = vld [vmem:[%s3095_s4 + $0x8] sm:$0xff]  }
 0x238   : > { %1191 = vrot.lane.b32.xlu1 %v2585_v37, %s2186_s18  ;;  %1929 = vmatprep.subr.bf16.mxu1 %v2012_v24 }
 0x239   : > { %v2606_v26 = vpop.permute.xlu0 %890  ;;  %1930 = vmatpush3.bf16.msra.mxu1 %v2012_v24 }
 0x23a   : > { %v746_v41 = vpop.permute.xlu1 %745  ;;  %1931 = vmatprep.subr.bf16.mxu1 %v2013_v28 }
 0x23b   : > { %767 = vst.msk [vmem:[#allocation3 + $0x18] sm:$0xff] %vm763_vm4, %v746_v41  ;;  %1288 = vrot.lane.b32.xlu0 %v681_v22, %s2188_s20  ;;  %v2015_v22 = vld [vmem:[%s3095_s4 + $0x20] sm:$0xff]   ;;  %v2016_v41 = vld [vmem:[%s3095_s4 + $0x28] sm:$0xff]  }
 0x23c   : > { %700 = vrot.lane.b32.xlu1 %v679_v57, %s3112_s13 }
 0x23d   : > { %v2611_v18 = vpop.permute.xlu0 %939  ;;  %1932 = vmatpush3.bf16.msra.mxu1 %v2013_v28 }
 0x23e   : > { %v795_v42 = vpop.permute.xlu1 %794  ;;  %1933 = vmatprep.subr.bf16.mxu1 %v2014_v2 }
 0x23f   : > { %816 = vst.msk [vmem:[#allocation3 + $0x18] sm:$0xff] %vm812_vm5, %v795_v42  ;;  %1337 = vrot.lane.b32.xlu0 %v730_v36, %s2189_s21 }
 0x240   : > { %1040 = vrot.lane.b32.xlu1 %v2537_v58, %s3109_s9 }
 0x241   : > { %v2617_v44 = vpop.permute.xlu0 %988  ;;  %1934 = vmatpush3.bf16.msra.mxu1 %v2014_v2 }
 0x242   : > { %v2619_v46 = vpop.permute.xlu1 %1036  ;;  %1935 = vmatprep.subr.bf16.mxu1 %v2015_v22 }
 0x243   : > { %845 = vrot.lane.b32.xlu0 %v2537_v58, %s3116_s19 }
 0x244   : > { %749 = vrot.lane.b32.xlu1 %v728_v47, %s2183_s15 }
 0x245   : > { %v2624_v48 = vpop.permute.xlu0 %1231  ;;  %1936 = vmatpush3.bf16.msra.mxu1 %v2015_v22 }
 0x246   : > { %v2626_v4 = vpop.permute.xlu1 %1085  ;;  %1937 = vmatprep.subr.bf16.mxu1 %v2016_v41 }
 0x247   : > { %894 = vrot.lane.b32.xlu0 %v679_v57, %s3111_s23 }
 0x248   : > { %1089 = vrot.lane.b32.xlu1 %v679_v57, %s3115_s22 }
 0x249   : > { %v2630_v50 = vpop.permute.xlu0 %1280  ;;  %1938 = vmatpush3.bf16.msra.mxu1 %v2016_v41 }
 0x24a   : > { %v2632_v53 = vpop.permute.xlu1 %1134 }
 0x24b   : > { %1235 = vrot.lane.b32.xlu0 %v2537_v58, %s3117_s14 }
 0x24c   : > { %798 = vrot.lane.b32.xlu1 %v777_v39, %s3107_s17  ;;  %s3118_s17 = smov 120  }
 0x24d   : > { %v2637_v54 = vpop.permute.xlu0 %1329 }
 0x24e   : > { %v2639_v56 = vpop.permute.xlu1 %1183 }
 0x24f   : > { %943 = vrot.lane.b32.xlu0 %v728_v47, %s3108_s29 }
 0x250   : > { %1138 = vrot.lane.b32.xlu1 %v728_v47, %s2184_s16 }
 0x251   : > { %v2643_v59 = vpop.permute.xlu0 %1378 }
 0x252   : > { %v693_v43 = vpop.permute.xlu1 %692 }
 0x253   : > { %716 = vst.msk [vmem:[#allocation3 + $0x8] sm:$0xff] %vm714_vm3, %v693_v43  ;;  %1284 = vrot.lane.b32.xlu0 %v679_v57, %s2188_s20  ;;  %v2018_v43 = vld [vmem:[%s3095_s4 + $0x38] sm:$0xff]  }
 0x254   : > { %1187 = vrot.lane.b32.xlu1 %v777_v39, %s2186_s18 }
 0x255   : > { %v838_v29 = vpop.permute.xlu0 %837 }
 0x256   : > { %v742_v31 = vpop.permute.xlu1 %741  ;;  %862 = vst.msk [vmem:[#allocation3] sm:$0xff] %vm861_vm6, %v838_v29 }
 0x257   : > { %765 = vst.msk [vmem:[#allocation3 + $0x8] sm:$0xff] %vm763_vm4, %v742_v31  ;;  %992 = vrot.lane.b32.xlu0 %v777_v39, %s3110_s8 }
 0x258   : > { %851 = vrot.lane.b32.xlu1 %v828_v60, %s3116_s19 }
 0x259   : > { %v887_v61 = vpop.permute.xlu0 %886 }
 0x25a   : > { %v791_v51 = vpop.permute.xlu1 %790  ;;  %911 = vst.msk [vmem:[#allocation3] sm:$0xff] %vm910_vm7, %v887_v61 }
 0x25b   : > { %814 = vst.msk [vmem:[#allocation3 + $0x8] sm:$0xff] %vm812_vm5, %v791_v51  ;;  %1333 = vrot.lane.b32.xlu0 %v728_v47, %s2189_s21  ;;  %v2017_v47 = vld [vmem:[%s3095_s4 + $0x30] sm:$0xff]  }
 0x25c   : > { %900 = vrot.lane.b32.xlu1 %v877_v45, %s3111_s23  ;;  %s3119_s23 = smov 40   ;;  %1939 = vmatprep.subr.bf16.mxu1 %v2017_v47 }
 0x25d   : > { %v936_v62 = vpop.permute.xlu0 %935  ;;  %1940 = vmatpush3.bf16.msra.mxu1 %v2017_v47 }
 0x25e   : > { %v844_v32 = vpop.permute.xlu1 %843  ;;  %960 = vst.msk [vmem:[#allocation3] sm:$0xff] %vm959_vm8, %v936_v62  ;;  %1941 = vmatprep.subr.bf16.mxu1 %v2018_v43 }
 0x25f   : > { %865 = vst.msk [vmem:[#allocation3 + $0x18] sm:$0xff] %vm861_vm6, %v844_v32  ;;  %1382 = vrot.lane.b32.xlu0 %v777_v39, %s3118_s17 }
 0x260   : > { %949 = vrot.lane.b32.xlu1 %v926_v63, %s3108_s29 }
 0x261   : > { %v985_v0 = vpop.permute.xlu0 %984  ;;  %1942 = vmatpush3.bf16.msra.mxu1 %v2018_v43 }
 0x262   : > { %v893_v1 = vpop.permute.xlu1 %892  ;;  %1009 = vst.msk [vmem:[#allocation3] sm:$0xff] %vm1008_vm9, %v985_v0 }
 0x263   : > { %914 = vst.msk [vmem:[#allocation3 + $0x18] sm:$0xff] %vm910_vm7, %v893_v1  ;;  %1046 = vrot.lane.b32.xlu0 %v828_v60, %s3109_s9 }
 0x264   : > { %998 = vrot.lane.b32.xlu1 %v2662_v3, %s3110_s8 }
 0x265   : > { %v699_v5 = vpop.permute.xlu0 %698 }
 0x266   : > { %v942_v6 = vpop.permute.xlu1 %941  ;;  %719 = vst.msk [vmem:[#allocation3 + $0x20] sm:$0xff] %vm714_vm3, %v699_v5 }
 0x267   : > { %963 = vst.msk [vmem:[#allocation3 + $0x18] sm:$0xff] %vm959_vm8, %v942_v6  ;;  %1095 = vrot.lane.b32.xlu0 %v877_v45, %s3115_s22 }
 0x268   : > { %1241 = vrot.lane.b32.xlu1 %v828_v60, %s3117_s14 }
 0x269   : > { %v2671_v17 = vpop.permute.xlu0 %1038 }
 0x26a   : > { %v991_v19 = vpop.permute.xlu1 %990 }
 0x26b   : > { %1012 = vst.msk [vmem:[#allocation3 + $0x18] sm:$0xff] %vm1008_vm9, %v991_v19  ;;  %1144 = vrot.lane.b32.xlu0 %v926_v63, %s2184_s16 }
 0x26c   : > { %1290 = vrot.lane.b32.xlu1 %v877_v45, %s2188_s20 }
 0x26d   : > { %v748_v21 = vpop.permute.xlu0 %747 }
 0x26e   : > { %v2679_v23 = vpop.permute.xlu1 %1233  ;;  %768 = vst.msk [vmem:[#allocation3 + $0x20] sm:$0xff] %vm763_vm4, %v748_v21 }
 0x26f   : > { %1193 = vrot.lane.b32.xlu0 %v2662_v3, %s2186_s18 }
 0x270   : > { %1339 = vrot.lane.b32.xlu1 %v926_v63, %s2189_s21 }
 0x271   : > { %v2688_v49 = vpop.permute.xlu0 %1087 }
 0x272   : > { %v2690_v58 = vpop.permute.xlu1 %1282 }
 0x273   : > { %702 = vrot.lane.b32.xlu0 %v680_v27, %s3112_s13  ;;  %s3121_s13 = smov 64  }
 0x274   : > { %847 = vrot.lane.b32.xlu1 %v2545_v25, %s3116_s19  ;;  %s3120_s19 = smov 24  }
 0x275   : > { %v797_v30 = vpop.permute.xlu0 %796 }
 0x276   : > { %v2698_v33 = vpop.permute.xlu1 %1331  ;;  %817 = vst.msk [vmem:[#allocation3 + $0x20] sm:$0xff] %vm812_vm5, %v797_v30 }
 0x277   : > { %751 = vrot.lane.b32.xlu0 %v729_v52, %s2183_s15  ;;  %s3122_s15 = smov 48  }
 0x278   : > { %896 = vrot.lane.b32.xlu1 %v680_v27, %s3119_s23  ;;  %s1890_s23 = sshll.u32 %s2258_s28, 10 }
 0x279   : > { %v1137_v34 = vpop.permute.xlu0 %1136  ;;  %s3042_s9 = scalar_lea.hbm %s3098_s7, %s1890_s23 }
 0x27a   : > { %v2706_v35 = vpop.permute.xlu1 %1380 }
 0x27b   : > { %800 = vrot.lane.b32.xlu0 %v778_v40, %s3120_s19 }
 0x27c   : > { %1237 = vrot.lane.b32.xlu1 %v2545_v25, %s3117_s14 }
 0x27d   : > { %v1186_v36 = vpop.permute.xlu0 %1185 }
 0x27e   : > { %v695_v55 = vpop.permute.xlu1 %694 }
 0x27f   : > { %717 = vst.msk [vmem:[#allocation3 + $0x10] sm:$0xff] %vm714_vm3, %v695_v55  ;;  %1042 = vrot.lane.b32.xlu0 %v2545_v25, %s3121_s13 }
 0x280   : > { %945 = vrot.lane.b32.xlu1 %v729_v52, %s3122_s15 }
 0x281   : > { %v744_v57 = vpop.permute.xlu0 %743 }
 0x282   : > { %v840_v42 = vpop.permute.xlu1 %839  ;;  %766 = vst.msk [vmem:[#allocation3 + $0x10] sm:$0xff] %vm763_vm4, %v744_v57 }
 0x283   : > { %863 = vst.msk [vmem:[#allocation3 + $0x8] sm:$0xff] %vm861_vm6, %v840_v42  ;;  %1091 = vrot.lane.b32.xlu0 %v680_v27, %s3115_s22  ;;  %s3123_s22 = smov 56  }
 0x284   : > { %1286 = vrot.lane.b32.xlu1 %v680_v27, %s2188_s20 }
 0x285   : > { %v793_v25 = vpop.permute.xlu0 %792 }
 0x286   : > { %v889_v39 = vpop.permute.xlu1 %888  ;;  %815 = vst.msk [vmem:[#allocation3 + $0x10] sm:$0xff] %vm812_vm5, %v793_v25 }
 0x287   : > { %912 = vst.msk [vmem:[#allocation3 + $0x8] sm:$0xff] %vm910_vm7, %v889_v39  ;;  %1140 = vrot.lane.b32.xlu0 %v729_v52, %s2184_s16 }
 0x288   : > { %864 = vst.msk [vmem:[#allocation3 + $0x10] sm:$0xff] %vm861_vm6, %v2599_v38  ;;  %994 = vrot.lane.b32.xlu1 %v778_v40, %s3123_s22  ;;  %s2195_s22 = smov [#allocation4]  }
 0x289   : > { %913 = vst.msk [vmem:[#allocation3 + $0x10] sm:$0xff] %vm910_vm7, %v2606_v26  ;;  %v1035_v29 = vpop.permute.xlu0 %1034  ;;  %s2119_s16 = sshll.u32 %s2195_s22, 4  ;;  %s2120_s16 = int_to_ptr.vmem [resolvable:$false] %s2119_s16 }
 0x28a   : > { %962 = vst.msk [vmem:[#allocation3 + $0x10] sm:$0xff] %vm959_vm8, %v2611_v18  ;;  %v938_v31 = vpop.permute.xlu1 %937  ;;  %v1368_v18 = vld [vmem:[#allocation2 + $0x93] sm:$0xff] }
 0x28b   : > { %1011 = vst.msk [vmem:[#allocation3 + $0x10] sm:$0xff] %vm1008_vm9, %v2617_v44  ;;  %1189 = vrot.lane.b32.xlu0 %v778_v40, %s2186_s18 }
 0x28c   : > { %1059 = vst.msk [vmem:[#allocation3] sm:$0xff] %vm1058_vm10, %v1035_v29  ;;  %1061 = vst.msk [vmem:[#allocation3 + $0x10] sm:$0xff] %vm1058_vm10, %v2671_v17  ;;  %1335 = vrot.lane.b32.xlu1 %v729_v52, %s2189_s21  ;;  %s270_s21 = sand.u32 1, %s2169_s25  }
 0x28d   : > { %961 = vst.msk [vmem:[#allocation3 + $0x8] sm:$0xff] %vm959_vm8, %v938_v31  ;;  %v1084_v38 = vpop.permute.xlu0 %1083  ;;  %s1838_s13 = sshll.u32 %s270_s21, 6  ;;  %s3049_s29 = scalar_lea.sflag [#allocation5], %s270_s21 }
 0x28e   : > { %1110 = vst.msk [vmem:[#allocation3 + $0x10] sm:$0xff] %vm1107_vm11, %v2688_v49  ;;  %v987_v26 = vpop.permute.xlu1 %986  ;;  %1108 = vst.msk [vmem:[#allocation3] sm:$0xff] %vm1107_vm11, %v1084_v38  ;;  %s3026_s15 = scalar_lea.vmem [#allocation4], %s1838_s13 }
 0x28f   : > { %1159 = vst.msk [vmem:[#allocation3 + $0x10] sm:$0xff] %vm1156_vm12, %v1137_v34  ;;  %1386 = vrot.lane.b32.xlu0 %v2585_v37, %s3118_s17  ;;  %v1369_v37 = vld [vmem:[#allocation2 + $0xa3] sm:$0xff]  ;;  %s1772_s8 = sshll.u32 %s3026_s15, 4  ;;  %s3044_s8 = int_to_ptr.vmem [resolvable:$true] %s1772_s8 }
 0x290   : > { %1010 = vst.msk [vmem:[#allocation3 + $0x8] sm:$0xff] %vm1008_vm9, %v987_v26  ;;  %1384 = vrot.lane.b32.xlu1 %v778_v40, %s3118_s17  ;;  %s2115_s28 = scalar_lea.vmem %s3044_s8, 1024  ;;  %p2122_p0 = scmp.lt.s32.totalorder %s3044_s8, %s2120_s16 }
 0x291   : > { %1208 = vst.msk [vmem:[#allocation3 + $0x10] sm:$0xff] %vm1205_vm13, %v1186_v36  ;;  %v1133_v44 = vpop.permute.xlu0 %1132  ;;  %p2116_p11 = scmp.ne.s32.totalorder %s3044_s8, %s2115_s28 }
 0x292   : > { %1060 = vst.msk [vmem:[#allocation3 + $0x8] sm:$0xff] %vm1058_vm10, %v2619_v46  ;;  %v705_v60 = vpop.permute.xlu1 %704 }
 0x293   : > { %1109 = vst.msk [vmem:[#allocation3 + $0x8] sm:$0xff] %vm1107_vm11, %v2626_v4  ;;  %1390 = vrot.lane.b32.xlu0 %v1368_v18, %s3118_s17  ;;  %p2117_p12 = pnand %p2116_p11, %p2275_p5 }
 0x294   : > { %1158 = vst.msk [vmem:[#allocation3 + $0x8] sm:$0xff] %vm1156_vm12, %v2632_v53  ;;  %1157 = vst.msk [vmem:[#allocation3] sm:$0xff] %vm1156_vm12, %v1133_v44  ;;  %1388 = vrot.lane.b32.xlu1 %v2662_v3, %s3118_s17 }
 0x295   : > { %1207 = vst.msk [vmem:[#allocation3 + $0x8] sm:$0xff] %vm1205_vm13, %v2639_v56  ;;  %v1182_v46 = vpop.permute.xlu0 %1181  ;;  %p2118_p13 = pneg %p2117_p12 }
 0x296   : > { %722 = vst.msk [vmem:[#allocation3 + $0x38] sm:$0xff] %vm714_vm3, %v705_v60  ;;  %v754_v4 = vpop.permute.xlu1 %753 }
 0x297   : > { %1257 = vst.msk [vmem:[#allocation3 + $0x8] sm:$0xff] %vm1255_vm14, %v2679_v23 }
 0x298   : > { %1306 = vst.msk [vmem:[#allocation3 + $0x8] sm:$0xff] %vm1304_vm15, %v2690_v58  ;;  %1392 = vrot.lane.b32.xlu1 %v1369_v37, %s3118_s17  ;;  %s2121_s17 = scalar_lea.vmem %s2120_s16, 2048 }
 0x299   : > { %1355 = vst.msk [vmem:[#allocation3 + $0x8] sm:$0xff] %vm1353_vm0, %v2698_v33  ;;  %v2788_v53 = vpop.permute.xlu0 %849  ;;  %p2123_p1 = scmp.lt.s32.totalorder %s2121_s17, %s2115_s28 }
 0x29a   : > { %1404 = vst.msk [vmem:[#allocation3 + $0x8] sm:$0xff] %vm1402_vm1, %v2706_v35  ;;  %v803_v56 = vpop.permute.xlu1 %802 }
 0x29b   : > { %1206 = vst.msk [vmem:[#allocation3] sm:$0xff] %vm1205_vm13, %v1182_v46  ;;  %p2124_p2 = por %p2123_p1, %p2122_p0 }
 0x29c   : > { %771 = vst.msk [vmem:[#allocation3 + $0x38] sm:$0xff] %vm763_vm4, %v754_v4 }
 0x29d   : > { %1256 = vst.msk [vmem:[#allocation3] sm:$0xff] %vm1255_vm14, %v2624_v48  ;;  %v2793_v61 = vpop.permute.xlu0 %898  ;;  %p2125_p3 = pnand %p2124_p2, %p2118_p13 }
 0x29e   : > { %1305 = vst.msk [vmem:[#allocation3] sm:$0xff] %vm1304_vm15, %v2630_v50  ;;  %v2795_v51 = vpop.permute.xlu1 %1044 }
 0x29f   : > { %1354 = vst.msk [vmem:[#allocation3] sm:$0xff] %vm1353_vm0, %v2637_v54 }
 0x2a0   : > { %1403 = vst.msk [vmem:[#allocation3] sm:$0xff] %vm1402_vm1, %v2643_v59 }
 0x2a1   : > { %820 = vst.msk [vmem:[#allocation3 + $0x38] sm:$0xff] %vm812_vm5, %v803_v56  ;;  %v2797_v48 = vpop.permute.xlu0 %947  ;;  %v1412_v62 = vld [vmem:[#allocation3 + $0x8] sm:$0xff] }
 0x2a2   : > { %v2799_v45 = vpop.permute.xlu1 %1093 }
 0x2a5   : > { %v2801_v54 = vpop.permute.xlu0 %996 }
 0x2a6   : > { %v2803_v63 = vpop.permute.xlu1 %1142 }
 0x2a7   : > { %v1411_v50 = vld [vmem:[#allocation3] sm:$0xff] }
 0x2a8   : > { %v1419_v32 = vpack.c.bf16 %v1412_v62, %v1411_v50 }
 0x2a9   : > { %v2805_v0 = vpop.permute.xlu0 %1239 }
 0x2aa   : > { %1943 = vmatprep.mubr.bf16.mxu1 %v1419_v32  ;;  %v2807_v59 = vpop.permute.xlu1 %1191 }
 0x2ad   : > { %v2809_v1 = vpop.permute.xlu0 %1288 }
 0x2ae   : > { %v701_v3 = vpop.permute.xlu1 %700 }
 0x2af   : > { %720 = vst.msk [vmem:[#allocation3 + $0x28] sm:$0xff] %vm714_vm3, %v701_v3 }
 0x2b1   : > { %v2812_v5 = vpop.permute.xlu0 %1337 }
 0x2b2   : > { %v1041_v6 = vpop.permute.xlu1 %1040 }
 0x2b3   : > { %1062 = vst.msk [vmem:[#allocation3 + $0x18] sm:$0xff] %vm1058_vm10, %v1041_v6 }
 0x2b5   : > { %v846_v17 = vpop.permute.xlu0 %845 }
 0x2b6   : > { %v750_v19 = vpop.permute.xlu1 %749  ;;  %866 = vst.msk [vmem:[#allocation3 + $0x20] sm:$0xff] %vm861_vm6, %v846_v17 }
 0x2b7   : > { %769 = vst.msk [vmem:[#allocation3 + $0x28] sm:$0xff] %vm763_vm4, %v750_v19 }
 0x2b9   : > { %v895_v20 = vpop.permute.xlu0 %894 }
 0x2ba   : > { %v1090_v21 = vpop.permute.xlu1 %1089  ;;  %915 = vst.msk [vmem:[#allocation3 + $0x20] sm:$0xff] %vm910_vm7, %v895_v20 }
 0x2bb   : > { %1111 = vst.msk [vmem:[#allocation3 + $0x18] sm:$0xff] %vm1107_vm11, %v1090_v21 }
 0x2bd   : > { %v1236_v23 = vpop.permute.xlu0 %1235 }
 0x2be   : > { %v799_v24 = vpop.permute.xlu1 %798  ;;  %1258 = vst.msk [vmem:[#allocation3 + $0x10] sm:$0xff] %vm1255_vm14, %v1236_v23 }
 0x2bf   : > { %818 = vst.msk [vmem:[#allocation3 + $0x28] sm:$0xff] %vm812_vm5, %v799_v24 }
 0x2c1   : > { %v944_v49 = vpop.permute.xlu0 %943 }
 0x2c2   : > { %v1139_v58 = vpop.permute.xlu1 %1138  ;;  %964 = vst.msk [vmem:[#allocation3 + $0x20] sm:$0xff] %vm959_vm8, %v944_v49 }
 0x2c3   : > { %1160 = vst.msk [vmem:[#allocation3 + $0x18] sm:$0xff] %vm1156_vm12, %v1139_v58 }
 0x2c5   : > { %v1285_v27 = vpop.permute.xlu0 %1284 }
 0x2c6   : > { %v1188_v28 = vpop.permute.xlu1 %1187  ;;  %1307 = vst.msk [vmem:[#allocation3 + $0x10] sm:$0xff] %vm1304_vm15, %v1285_v27 }
 0x2c7   : > { %1209 = vst.msk [vmem:[#allocation3 + $0x18] sm:$0xff] %vm1205_vm13, %v1188_v28 }
 0x2c9   : > { %v993_v30 = vpop.permute.xlu0 %992 }
 0x2ca   : > { %v852_v33 = vpop.permute.xlu1 %851  ;;  %1013 = vst.msk [vmem:[#allocation3 + $0x20] sm:$0xff] %vm1008_vm9, %v993_v30 }
 0x2cb   : > { %869 = vst.msk [vmem:[#allocation3 + $0x38] sm:$0xff] %vm861_vm6, %v852_v33 }
 0x2cd   : > { %v1334_v52 = vpop.permute.xlu0 %1333 }
 0x2ce   : > { %v901_v2 = vpop.permute.xlu1 %900  ;;  %1356 = vst.msk [vmem:[#allocation3 + $0x10] sm:$0xff] %vm1353_vm0, %v1334_v52 }
 0x2cf   : > { %918 = vst.msk [vmem:[#allocation3 + $0x38] sm:$0xff] %vm910_vm7, %v901_v2 }
 0x2d1   : > { %v1383_v34 = vpop.permute.xlu0 %1382 }
 0x2d2   : > { %v950_v35 = vpop.permute.xlu1 %949  ;;  %1405 = vst.msk [vmem:[#allocation3 + $0x10] sm:$0xff] %vm1402_vm1, %v1383_v34 }
 0x2d3   : > { %967 = vst.msk [vmem:[#allocation3 + $0x38] sm:$0xff] %vm959_vm8, %v950_v35 }
 0x2d5   : > { %v1047_v40 = vpop.permute.xlu0 %1046 }
 0x2d6   : > { %v999_v22 = vpop.permute.xlu1 %998 }
 0x2d7   : > { %1016 = vst.msk [vmem:[#allocation3 + $0x38] sm:$0xff] %vm1008_vm9, %v999_v22 }
 0x2d8   : > { %1066 = vst.msk [vmem:[#allocation3 + $0x38] sm:$0xff] %vm1058_vm10, %v2403_v7 }
 0x2d9   : > { %1115 = vst.msk [vmem:[#allocation3 + $0x38] sm:$0xff] %vm1107_vm11, %v2405_v8  ;;  %v1096_v36 = vpop.permute.xlu0 %1095  ;;  %v1413_v44 = vld [vmem:[#allocation3 + $0x10] sm:$0xff] }
 0x2da   : > { %1164 = vst.msk [vmem:[#allocation3 + $0x38] sm:$0xff] %vm1156_vm12, %v2407_v9  ;;  %v1242_v55 = vpop.permute.xlu1 %1241 }
 0x2db   : > { %1213 = vst.msk [vmem:[#allocation3 + $0x38] sm:$0xff] %vm1205_vm13, %v2409_v10 }
 0x2dc   : > { %1263 = vst.msk [vmem:[#allocation3 + $0x38] sm:$0xff] %vm1255_vm14, %v2411_v11 }
 0x2dd   : > { %1312 = vst.msk [vmem:[#allocation3 + $0x38] sm:$0xff] %vm1304_vm15, %v2415_v13  ;;  %v1145_v41 = vpop.permute.xlu0 %1144 }
 0x2de   : > { %1361 = vst.msk [vmem:[#allocation3 + $0x38] sm:$0xff] %vm1353_vm0, %v2419_v15  ;;  %v1291_v7 = vpop.permute.xlu1 %1290 }
 0x2e1   : > { %v1194_v8 = vpop.permute.xlu0 %1193 }
 0x2e2   : > { %v1340_v57 = vpop.permute.xlu1 %1339 }
 0x2e5   : > { %v703_v42 = vpop.permute.xlu0 %702 }
 0x2e6   : > { %v848_v9 = vpop.permute.xlu1 %847  ;;  %721 = vst.msk [vmem:[#allocation3 + $0x30] sm:$0xff] %vm714_vm3, %v703_v42 }
 0x2e7   : > { %867 = vst.msk [vmem:[#allocation3 + $0x28] sm:$0xff] %vm861_vm6, %v848_v9 }
 0x2e9   : > { %v752_v10 = vpop.permute.xlu0 %751 }
 0x2ea   : > { %v897_v47 = vpop.permute.xlu1 %896  ;;  %770 = vst.msk [vmem:[#allocation3 + $0x30] sm:$0xff] %vm763_vm4, %v752_v10 }
 0x2eb   : > { %916 = vst.msk [vmem:[#allocation3 + $0x28] sm:$0xff] %vm910_vm7, %v897_v47 }
 0x2ed   : > { %v801_v11 = vpop.permute.xlu0 %800 }
 0x2ee   : > { %v1238_v13 = vpop.permute.xlu1 %1237  ;;  %819 = vst.msk [vmem:[#allocation3 + $0x30] sm:$0xff] %vm812_vm5, %v801_v11 }
 0x2ef   : > { %1259 = vst.msk [vmem:[#allocation3 + $0x18] sm:$0xff] %vm1255_vm14, %v1238_v13 }
 0x2f0   : > { %868 = vst.msk [vmem:[#allocation3 + $0x30] sm:$0xff] %vm861_vm6, %v2788_v53 }
 0x2f1   : > { %917 = vst.msk [vmem:[#allocation3 + $0x30] sm:$0xff] %vm910_vm7, %v2793_v61  ;;  %v1043_v15 = vpop.permute.xlu0 %1042 }
 0x2f2   : > { %966 = vst.msk [vmem:[#allocation3 + $0x30] sm:$0xff] %vm959_vm8, %v2797_v48  ;;  %v946_v25 = vpop.permute.xlu1 %945 }
 0x2f3   : > { %1015 = vst.msk [vmem:[#allocation3 + $0x30] sm:$0xff] %vm1008_vm9, %v2801_v54 }
 0x2f4   : > { %1063 = vst.msk [vmem:[#allocation3 + $0x20] sm:$0xff] %vm1058_vm10, %v1043_v15  ;;  %1065 = vst.msk [vmem:[#allocation3 + $0x30] sm:$0xff] %vm1058_vm10, %v1047_v40 }
 0x2f5   : > { %965 = vst.msk [vmem:[#allocation3 + $0x28] sm:$0xff] %vm959_vm8, %v946_v25  ;;  %v1092_v39 = vpop.permute.xlu0 %1091 }
 0x2f6   : > { %1114 = vst.msk [vmem:[#allocation3 + $0x30] sm:$0xff] %vm1107_vm11, %v1096_v36  ;;  %v1287_v43 = vpop.permute.xlu1 %1286  ;;  %1112 = vst.msk [vmem:[#allocation3 + $0x20] sm:$0xff] %vm1107_vm11, %v1092_v39 }
 0x2f7   : > { %1163 = vst.msk [vmem:[#allocation3 + $0x30] sm:$0xff] %vm1156_vm12, %v1145_v41 }
 0x2f8   : > { %1212 = vst.msk [vmem:[#allocation3 + $0x30] sm:$0xff] %vm1205_vm13, %v1194_v8 }
 0x2f9   : > { %1308 = vst.msk [vmem:[#allocation3 + $0x18] sm:$0xff] %vm1304_vm15, %v1287_v43  ;;  %v1141_v29 = vpop.permute.xlu0 %1140 }
 0x2fa   : > { %1262 = vst.msk [vmem:[#allocation3 + $0x30] sm:$0xff] %vm1255_vm14, %v2413_v12  ;;  %v995_v31 = vpop.permute.xlu1 %994 }
 0x2fb   : > { %1311 = vst.msk [vmem:[#allocation3 + $0x30] sm:$0xff] %vm1304_vm15, %v2417_v14 }
 0x2fc   : > { %1360 = vst.msk [vmem:[#allocation3 + $0x30] sm:$0xff] %vm1353_vm0, %v2421_v16 }
 0x2fd   : > { %1161 = vst.msk [vmem:[#allocation3 + $0x20] sm:$0xff] %vm1156_vm12, %v1141_v29  ;;  %v1190_v12 = vpop.permute.xlu0 %1189 }
 0x2fe   : > { %1014 = vst.msk [vmem:[#allocation3 + $0x28] sm:$0xff] %vm1008_vm9, %v995_v31  ;;  %v1336_v14 = vpop.permute.xlu1 %1335 }
 0x2ff   : > { %1064 = vst.msk [vmem:[#allocation3 + $0x28] sm:$0xff] %vm1058_vm10, %v2795_v51 }
 0x300   : > { %1113 = vst.msk [vmem:[#allocation3 + $0x28] sm:$0xff] %vm1107_vm11, %v2799_v45 }
 0x301   : > { %1162 = vst.msk [vmem:[#allocation3 + $0x28] sm:$0xff] %vm1156_vm12, %v2803_v63  ;;  %v1387_v16 = vpop.permute.xlu0 %1386 }
 0x302   : > { %1211 = vst.msk [vmem:[#allocation3 + $0x28] sm:$0xff] %vm1205_vm13, %v2807_v59  ;;  %1210 = vst.msk [vmem:[#allocation3 + $0x20] sm:$0xff] %vm1205_vm13, %v1190_v12  ;;  %v1385_v38 = vpop.permute.xlu1 %1384 }
 0x303   : > { %1357 = vst.msk [vmem:[#allocation3 + $0x18] sm:$0xff] %vm1353_vm0, %v1336_v14 }
 0x304   : > { %1261 = vst.msk [vmem:[#allocation3 + $0x28] sm:$0xff] %vm1255_vm14, %v1242_v55  ;;  %1260 = vst.msk [vmem:[#allocation3 + $0x20] sm:$0xff] %vm1255_vm14, %v2805_v0 }
 0x305   : > { %1310 = vst.msk [vmem:[#allocation3 + $0x28] sm:$0xff] %vm1304_vm15, %v1291_v7  ;;  %1309 = vst.msk [vmem:[#allocation3 + $0x20] sm:$0xff] %vm1304_vm15, %v2809_v1  ;;  %v1391_v18 = vpop.permute.xlu0 %1390 }
 0x306   : > { %1359 = vst.msk [vmem:[#allocation3 + $0x28] sm:$0xff] %vm1353_vm0, %v1340_v57  ;;  %1358 = vst.msk [vmem:[#allocation3 + $0x20] sm:$0xff] %vm1353_vm0, %v2812_v5  ;;  %v1389_v26 = vpop.permute.xlu1 %1388 }
 0x307   : > { %1407 = vst.msk [vmem:[#allocation3 + $0x20] sm:$0xff] %vm1402_vm1, %v1387_v16  ;;  %1406 = vst.msk [vmem:[#allocation3 + $0x18] sm:$0xff] %vm1402_vm1, %v1385_v38 }
 0x308   : > { %1408 = vst.msk [vmem:[#allocation3 + $0x28] sm:$0xff] %vm1402_vm1, %v1389_v26  ;;  %1409 = vst.msk [vmem:[#allocation3 + $0x30] sm:$0xff] %vm1402_vm1, %v1391_v18 }
 0x30a   : > { %v1393_v37 = vpop.permute.xlu1 %1392 }
 0x30b   : > { %1410 = vst.msk [vmem:[#allocation3 + $0x38] sm:$0xff] %vm1402_vm1, %v1393_v37 }
 0x30e   : > { %v1414_v60 = vld [vmem:[#allocation3 + $0x18] sm:$0xff]  ;;  %v1415_v4 = vld [vmem:[#allocation3 + $0x20] sm:$0xff] }
 0x30f   : > { %v1420_v46 = vpack.c.bf16 %v1414_v60, %v1413_v44  ;;  %v1416_v53 = vld [vmem:[#allocation3 + $0x28] sm:$0xff]  ;;  %v1417_v61 = vld [vmem:[#allocation3 + $0x30] sm:$0xff] }
 0x310   : > { %v1421_v56 = vpack.c.bf16 %v1416_v53, %v1415_v4 }
 0x311   : > { %1944 = vmatmul.mubr.bf16.vlgmr.msra.gmra.mrb[0].mxu1 %v1420_v46 }
 0x312   : > { %1947 = vmatprep.mubr.bf16.mxu1 %v1421_v56  ;;  %v1418_v51 = vld [vmem:[#allocation3 + $0x38] sm:$0xff] }
 0x313   : > { %v1422_v48 = vpack.c.bf16 %v1418_v51, %v1417_v61 }
 0x319   : > { %1948 = vmatmul.mubr.bf16.gmra.mrb[4].mxu1 %v1422_v48 }
 0x3e4   : > { %v2900_v45 = vpop.f32.mrb[0].mxu1 }
 0x3e5   : > { %1558 = vadd.xlane.f32.xlu0 %v2900_v45  ;;  %v2903_v50 = vpop.f32.mrb[1].mxu1  ;;  %v1580_v3 = vmul.f32 %v2900_v45, %v2900_v45 }
 0x3e6   : > { %v2905_v62 = vpop.f32.mrb[2].mxu1  ;;  %v1578_v6 = vmul.f32 %v2903_v50, %v2903_v50 }
 0x3e7   : > { %v2907_v32 = vpop.f32.mrb[3].mxu1  ;;  %v1581_v54 = vmul.f32 %v2905_v62, %v2905_v62 }
 0x3e8   : > { %1556 = vadd.xlane.f32.xlu1 %v2907_v32  ;;  %v1579_v59 = vmul.f32 %v2907_v32, %v2907_v32 }
 0x3e9   : > { %1554 = vadd.xlane.f32.xlu0 %v2903_v50 }
 0x3ec   : > { %1592 = vadd.xlane.f32.xlu1 %v1581_v54  ;;  %v2913_v63 = vpop.f32.mrb[4].mxu1 }
 0x3ed   : > { %1560 = vadd.xlane.f32.xlu0 %v2905_v62  ;;  %v2916_v0 = vpop.f32.mrb[5].mxu1  ;;  %v1584_v21 = vmul.f32 %v2913_v63, %v2913_v63 }
 0x3ee   : > { %v2920_v1 = vpop.f32.mrb[6].mxu1  ;;  %v1582_v20 = vmul.f32 %v2916_v0, %v2916_v0 }
 0x3ef   : > { %v2924_v5 = vpop.f32.mrb[7].mxu1  ;;  %v1585_v19 = vmul.f32 %v2920_v1, %v2920_v1 }
 0x3f0   : > { %1588 = vadd.xlane.f32.xlu1 %v1579_v59  ;;  %v1583_v17 = vmul.f32 %v2924_v5, %v2924_v5 }
 0x3f1   : > { %1590 = vadd.xlane.f32.xlu0 %v1580_v3 }
 0x3f4   : > { %1568 = vadd.xlane.f32.xlu1 %v2920_v1 }
 0x3f5   : > { %1586 = vadd.xlane.f32.xlu0 %v1578_v6  ;;  %v2968_v6 = vld [vmem:[%s3096_s5] ss:$0 sm:$0xff] }
 0x3f8   : > { %1564 = vadd.xlane.f32.xlu1 %v2924_v5 }
 0x3f9   : > { %1566 = vadd.xlane.f32.xlu0 %v2913_v63 }
 0x3fc   : > { %1596 = vadd.xlane.f32.xlu1 %v1583_v17 }
 0x3fd   : > { %1562 = vadd.xlane.f32.xlu0 %v2916_v0 }
 0x400   : > { %1600 = vadd.xlane.f32.xlu1 %v1585_v19 }
 0x401   : > { %1594 = vadd.xlane.f32.xlu0 %v1582_v20 }
 0x405   : > { %1598 = vadd.xlane.f32.xlu0 %v1584_v21 }
 0x472   : > { %v1559_v23 = vpop.xlane.xlu0 %1558 }
 0x473   : > { %v2942_v30 = vmul.f32 0.0625, %v1559_v23 }
 0x475   : > { %v1557_v24 = vpop.xlane.xlu1 %1556  ;;  %v1612_v36 = vmul.f32 %v2942_v30, %v2942_v30  ;;  %v1636_v21 = vsub.f32 %v2900_v45, %v2942_v30 }
 0x476   : > { %v1555_v49 = vpop.xlane.xlu0 %1554  ;;  %v2940_v27 = vmul.f32 0.0625, %v1557_v24 }
 0x477   : > { %v2948_v55 = vmul.f32 0.0625, %v1555_v49 }
 0x478   : > { %v1611_v35 = vmul.f32 %v2940_v27, %v2940_v27  ;;  %v1635_v3 = vsub.f32 %v2907_v32, %v2940_v27  ;;  %v2979_v32 = vld [vmem:[%s3097_s6] ss:$0 sm:$0xff] }
 0x479   : > { %v1593_v58 = vpop.xlane.xlu1 %1592  ;;  %v1610_v11 = vmul.f32 %v2948_v55, %v2948_v55 }
 0x47a   : > { %v1561_v28 = vpop.xlane.xlu0 %1560  ;;  %v1605_v52 = vmul.f32 0.0625, %v1593_v58 }
 0x47b   : > { %v1573_v33 = vmul.f32 0.0625, %v1561_v28 }
 0x47d   : > { %v1613_v2 = vmul.f32 %v1573_v33, %v1573_v33  ;;  %v1589_v34 = vpop.xlane.xlu1 %1588  ;;  %v1637_v56 = vsub.f32 %v2905_v62, %v1573_v33 }
 0x47e   : > { %v1603_v40 = vmul.f32 0.0625, %v1589_v34  ;;  %v1591_v22 = vpop.xlane.xlu0 %1590 }
 0x47f   : > { %v1621_v41 = vsub.f32 %v1605_v52, %v1613_v2  ;;  %v1604_v7 = vmul.f32 0.0625, %v1591_v22  ;;  %v1634_v22 = vsub.f32 %v2903_v50, %v2948_v55 }
 0x480   : > { %v1619_v8 = vsub.f32 %v1603_v40, %v1611_v35 }
 0x481   : > { %v1629_v57 = vmax.f32 %v1621_v41, 0.0  ;;  %v1620_v42 = vsub.f32 %v1604_v7, %v1612_v36  ;;  %v1569_v9 = vpop.xlane.xlu1 %1568 }
 0x482   : > { %v1627_v10 = vmax.f32 %v1619_v8, 0.0  ;;  %v1587_v47 = vpop.xlane.xlu0 %1586  ;;  %v2958_v46 = vmul.f32 0.0625, %v1569_v9 }
 0x483   : > { %v1645_v13 = vadd.f32 0.001, %v1629_v57  ;;  %v1628_v15 = vmax.f32 %v1620_v42, 0.0  ;;  %v1602_v25 = vmul.f32 0.0625, %v1587_v47 }
 0x484   : > { %v1643_v39 = vadd.f32 0.001, %v1627_v10  ;;  %v1617_v61 = vmul.f32 %v2958_v46, %v2958_v46 }
 0x485   : > { %2067 = vrsqrt.f32 %v1645_v13  ;;  %v1644_v43 = vadd.f32 0.001, %v1628_v15  ;;  %v1618_v29 = vsub.f32 %v1602_v25, %v1610_v11  ;;  %v1565_v31 = vpop.xlane.xlu1 %1564 }
 0x486   : > { %2069 = vrsqrt.f32 %v1643_v39  ;;  %v2952_v12 = vmul.f32 0.0625, %v1565_v31  ;;  %v1567_v14 = vpop.xlane.xlu0 %1566 }
 0x487   : > { %2071 = vrsqrt.f32 %v1644_v43  ;;  %v1626_v16 = vmax.f32 %v1618_v29, 0.0  ;;  %v2970_v17 = vmul.f32 0.0625, %v1567_v14 }
 0x488   : > { %v1615_v18 = vmul.f32 %v2952_v12, %v2952_v12  ;;  %v1639_v43 = vsub.f32 %v2924_v5, %v2952_v12 }
 0x489   : > { %v1642_v38 = vadd.f32 0.001, %v1626_v16  ;;  %v1597_v26 = vpop.xlane.xlu1 %1596  ;;  %v1616_v45 = vmul.f32 %v2970_v17, %v2970_v17  ;;  %v1641_v16 = vsub.f32 %v2920_v1, %v2958_v46  ;;  %v1640_v1 = vsub.f32 %v2913_v63, %v2970_v17 }
 0x48a   : > { %v1607_v44 = vmul.f32 0.0625, %v1597_v26  ;;  %v1563_v60 = vpop.xlane.xlu0 %1562 }
 0x48b   : > { %2073 = vrsqrt.f32 %v1642_v38  ;;  %v2956_v37 = vmul.f32 0.0625, %v1563_v60 }
 0x48c   : > { %v1623_v4 = vsub.f32 %v1607_v44, %v1615_v18 }
 0x48d   : > { %v1601_v53 = vpop.xlane.xlu1 %1600  ;;  %v1614_v62 = vmul.f32 %v2956_v37, %v2956_v37  ;;  %v1638_v18 = vsub.f32 %v2916_v0, %v2956_v37 }
 0x48e   : > { %v1631_v51 = vmax.f32 %v1623_v4, 0.0  ;;  %v1609_v48 = vmul.f32 0.0625, %v1601_v53  ;;  %v1595_v54 = vpop.xlane.xlu0 %1594 }
 0x48f   : > { %v2068_v59 = vpop.eup %2067  ;;  %v1606_v19 = vmul.f32 0.0625, %v1595_v54 }
 0x490   : > { %v2070_v20 = vpop.eup %2069  ;;  %v1661_v23 = vmul.f32 %v2068_v59, %v1637_v56  ;;  %v1647_v24 = vadd.f32 0.001, %v1631_v51  ;;  %v1625_v49 = vsub.f32 %v1609_v48, %v1617_v61 }
 0x491   : > { %v2072_v58 = vpop.eup %2071  ;;  %v1659_v27 = vmul.f32 %v2070_v20, %v1635_v3  ;;  %v1622_v28 = vsub.f32 %v1606_v19, %v1614_v62 }
 0x492   : > { %v1675_v33 = vmul.f32 %v2968_v6, %v1661_v23  ;;  %v1660_v52 = vmul.f32 %v2072_v58, %v1636_v21  ;;  %2075 = vrsqrt.f32 %v1647_v24  ;;  %v1633_v2 = vmax.f32 %v1625_v49, 0.0  ;;  %v1599_v34 = vpop.xlane.xlu0 %1598 }
 0x493   : > { %v1673_v35 = vmul.f32 %v2968_v6, %v1659_v27  ;;  %v1630_v30 = vmax.f32 %v1622_v28, 0.0  ;;  %v1608_v40 = vmul.f32 0.0625, %v1599_v34 }
 0x494   : > { %v2988_v36 = vadd.f32 %v2979_v32, %v1675_v33  ;;  %v1674_v41 = vmul.f32 %v2968_v6, %v1660_v52  ;;  %v1649_v7 = vadd.f32 0.001, %v1633_v2 }
 0x495   : > { %v2074_v8 = vpop.eup %2073  ;;  %v2992_v57 = vadd.f32 %v2979_v32, %v1673_v35  ;;  %v1646_v42 = vadd.f32 0.001, %v1630_v30  ;;  %v1624_v9 = vsub.f32 %v1608_v40, %v1616_v45 }
 0x496   : > { %v1880_v10 = vmul.f32 -1.442695, %v2988_v36  ;;  %v2996_v47 = vadd.f32 %v2979_v32, %v1674_v41  ;;  %v1658_v11 = vmul.f32 %v2074_v8, %v1634_v22  ;;  %2077 = vrsqrt.f32 %v1649_v7 }
 0x497   : > { %v1878_v50 = vmul.f32 -1.442695, %v2992_v57  ;;  %2079 = vrsqrt.f32 %v1646_v42  ;;  %v1632_v55 = vmax.f32 %v1624_v9, 0.0 }
 0x498   : > { %2081 = vpow2.f32 %v1880_v10  ;;  %v1879_v13 = vmul.f32 -1.442695, %v2996_v47  ;;  %v1672_v15 = vmul.f32 %v2968_v6, %v1658_v11 }
 0x499   : > { %2083 = vpow2.f32 %v1878_v50  ;;  %v1648_v25 = vadd.f32 0.001, %v1632_v55 }
 0x49a   : > { %2085 = vpow2.f32 %v1879_v13  ;;  %v3002_v39 = vadd.f32 %v2979_v32, %v1672_v15 }
 0x49b   : > { %2087 = vrsqrt.f32 %v1648_v25 }
 0x49c   : > { %v2076_v29 = vpop.eup %2075  ;;  %v1877_v31 = vmul.f32 -1.442695, %v3002_v39 }
 0x49d   : > { %v1663_v14 = vmul.f32 %v2076_v29, %v1639_v43 }
 0x49e   : > { %2089 = vpow2.f32 %v1877_v31 }
 0x49f   : > { %v1677_v38 = vmul.f32 %v2968_v6, %v1663_v14 }
 0x4a0   : > { %v2078_v26 = vpop.eup %2077 }
 0x4a1   : > { %v2080_v44 = vpop.eup %2079  ;;  %v1691_v60 = vadd.f32 %v2979_v32, %v1677_v38  ;;  %v1665_v4 = vmul.f32 %v2078_v26, %v1641_v16 }
 0x4a2   : > { %v2082_v5 = vpop.eup %2081  ;;  %v1662_v12 = vmul.f32 %v2080_v44, %v1638_v18 }
 0x4a3   : > { %v2084_v53 = vpop.eup %2083  ;;  %v1721_v56 = vadd.f32 1.0, %v2082_v5  ;;  %v1679_v61 = vmul.f32 %v2968_v6, %v1665_v4  ;;  %v1882_v46 = vmul.f32 -1.442695, %v1691_v60 }
 0x4a4   : > { %v2086_v51 = vpop.eup %2085  ;;  %v1719_v48 = vadd.f32 1.0, %v2084_v53  ;;  %v1676_v54 = vmul.f32 %v2968_v6, %v1662_v12 }
 0x4a5   : > { %v2088_v0 = vpop.eup %2087  ;;  %2091 = vrcp.f32 %v1721_v56  ;;  %v1720_v37 = vadd.f32 1.0, %v2086_v51  ;;  %v1693_v59 = vadd.f32 %v2979_v32, %v1679_v61 }
 0x4a6   : > { %2093 = vrcp.f32 %v1719_v48  ;;  %v1690_v3 = vadd.f32 %v2979_v32, %v1676_v54  ;;  %v1664_v62 = vmul.f32 %v2088_v0, %v1640_v1 }
 0x4a7   : > { %2095 = vrcp.f32 %v1720_v37  ;;  %v1884_v19 = vmul.f32 -1.442695, %v1693_v59 }
 0x4a8   : > { %v2090_v20 = vpop.eup %2089  ;;  %2097 = vpow2.f32 %v1882_v46  ;;  %v1881_v21 = vmul.f32 -1.442695, %v1690_v3  ;;  %v1678_v63 = vmul.f32 %v2968_v6, %v1664_v62 }
 0x4a9   : > { %v1718_v17 = vadd.f32 1.0, %v2090_v20  ;;  %2099 = vpow2.f32 %v1884_v19 }
 0x4aa   : > { %2101 = vpow2.f32 %v1881_v21  ;;  %v1692_v23 = vadd.f32 %v2979_v32, %v1678_v63 }
 0x4ab   : > { %2103 = vrcp.f32 %v1718_v17 }
 0x4ac   : > { %v1883_v24 = vmul.f32 -1.442695, %v1692_v23 }
 0x4ae   : > { %2105 = vpow2.f32 %v1883_v24 }
 0x4af   : > { %v2092_v49 = vpop.eup %2091 }
 0x4b0   : > { %v2094_v58 = vpop.eup %2093  ;;  %v1745_v27 = vmul.f32 %v2092_v49, %v2988_v36 }
 0x4b1   : > { %v2096_v28 = vpop.eup %2095  ;;  %v1743_v33 = vmul.f32 %v2094_v58, %v2992_v57 }
 0x4b2   : > { %v2098_v52 = vpop.eup %2097  ;;  %1753 = vst [vmem:[%s3026_s15 + $0x18] sm:$0xff] %v1745_v27  ;;  %v1744_v6 = vmul.f32 %v2096_v28, %v2996_v47 }
 0x4b3   : > { %v2100_v32 = vpop.eup %2099  ;;  %1751 = vst [vmem:[%s3026_s15 + $0x8] sm:$0xff] %v1743_v33  ;;  %v1723_v2 = vadd.f32 1.0, %v2098_v52 }
 0x4b4   : > { %v2102_v34 = vpop.eup %2101  ;;  %1752 = vst [vmem:[%s3026_s15 + $0x10] sm:$0xff] %v1744_v6  ;;  %v1725_v35 = vadd.f32 1.0, %v2100_v32 }
 0x4b5   : > { %v2104_v45 = vpop.eup %2103  ;;  %2107 = vrcp.f32 %v1723_v2  ;;  %v1722_v30 = vadd.f32 1.0, %v2102_v34 }
 0x4b6   : > { %v1742_v40 = vmul.f32 %v2104_v45, %v3002_v39  ;;  %2109 = vrcp.f32 %v1725_v35 }
 0x4b7   : > { %2111 = vrcp.f32 %v1722_v30 }
 0x4b8   : > { %v2106_v22 = vpop.eup %2105  ;;  %1750 = vst [vmem:[%s3026_s15] sm:$0xff] %v1742_v40 }
 0x4b9   : > { %v1724_v36 = vadd.f32 1.0, %v2106_v22 }
 0x4bb   : > { %2113 = vrcp.f32 %v1724_v36 }
 0x4bf   : > { %v2108_v41 = vpop.eup %2107 }
 0x4c0   : > { %v2110_v7 = vpop.eup %2109  ;;  %v1747_v8 = vmul.f32 %v2108_v41, %v1691_v60 }
 0x4c1   : > { %v2112_v57 = vpop.eup %2111  ;;  %v1749_v42 = vmul.f32 %v2110_v7, %v1693_v59 }
 0x4c2   : > { %1755 = vst [vmem:[%s3026_s15 + $0x28] sm:$0xff] %v1747_v8  ;;  %v1746_v9 = vmul.f32 %v2112_v57, %v1690_v3 }
 0x4c3   : > { %1757 = vst [vmem:[%s3026_s15 + $0x38] sm:$0xff] %v1749_v42 }
 0x4c4   : > { %1754 = vst [vmem:[%s3026_s15 + $0x20] sm:$0xff] %v1746_v9 }
 0x4c5   : > { %v2114_v10 = vpop.eup %2113 }
 0x4c6   : > { %v1748_v47 = vmul.f32 %v2114_v10, %v1692_v23 }
 0x4c8   : > { %1756 = vst [vmem:[%s3026_s15 + $0x30] sm:$0xff] %v1748_v47 }
 0x4c9   : > { %2128 = shalt.err (!%p2125_p3)
}
 0x4ca   : > { %s2129_s18 = scalar_lea.hbm %s3042_s9, 1024  ;;  %s2133_s13 = scalar_lea.hbm %s3098_s7, 2048 }
 0x4cb   : > { %p2130_p4 = scmp.ne.s32.totalorder %s3042_s9, %s2129_s18  ;;  %p2134_p9 = scmp.lt.u32.totalorder %s3042_s9, %s3098_s7 }
 0x4cc   : > { %p2135_p10 = scmp.lt.u32.totalorder %s2133_s13, %s2129_s18  ;;  %p2137_p12 = scmp.lt.u32.totalorder %s2129_s18, %s3042_s9 }
 0x4cd   : > { %p2131_p7 = pnand %p2130_p4, %p2275_p5 }
 0x4ce   : > { %p2136_p11 = por %p2135_p10, %p2134_p9 }
 0x4cf   : > { %p2132_p8 = pneg %p2131_p7 }
 0x4d0   : > { %p2138_p13 = por %p2137_p12, %p2136_p11 }
 0x4d2   : > { %p2139_p0 = pnand %p2138_p13, %p2132_p8 }
 0x4d4   : > { %2142 = shalt.err (!%p2139_p0)
}
 0x4d5   : > { %s2196_s14 = smov 128   ;;  %s3124_s19 = smov 8  }
 0x4d6   : > { %1951 = dma.vmem_to_hbm [thread:$0]  (%p2275_p5), %s3044_s8, 1024, %s3042_s9, %s3049_s29, %s2196_s14, %s2196_s14, %s3124_s19  }
 0x4d7 PF: > { %p1957_p1 = scmp.ge.s32.totalorder %s2177_s27, 2  ;;  %s1787_s28 = sand.u32 1, %s2165_s24  }
 0x4d8   : > { %s1788_s22 = scalar_lea.sflag [#allocation5], %s1787_s28 }
 0x4d9   : > { %p1954_p2 = pnand %p1957_p1, %p2279_p6 }
 0x4db   : > { %2160 = dma.done.wait (!%p1954_p2), %s1788_s22, 1024  }
 0x4dc   : > { %2162 = vsyncadd (!%p1954_p2), %s1788_s22, 4294966272  ;;  %p17_p3 = scmp.ge.s32.totalorder %s2262_s30, 4   ;;  %s3125_s24 = smov %s2169_s25 }
 0x4dd   : > { %s3126_s25 = smov %s2173_s26  ;;  %s3127_s26 = smov %s2273_s10 }
 0x4de   : > { %s3128_s27 = smov %s2262_s30  ;;  %19 = sbr.rel (!%p17_p3) target bundleno = 3 (0x3), region = 86 }
 0x4e5   :  { %1793 = vsyncpa [#allocation5], 1 }
 0x4e6   :  { %1795 = vsyncpa [#allocation5 + $0x1], 1 }

</bundles_post_ra>
